<compile_context>
chip_gen: v5e
topology: v5e:2x2
jax: 0.10.0
libtpu: 0.0.40
codegen_flags: <defaults>
</compile_context>

<pallas_src>
import numpy as np

import jax
import jax.numpy as jnp
from jax.experimental import pallas as pl
from jax.experimental.pallas import tpu as pltpu

_K = 5            # conv kernel size (both convs)
_C1, _C2 = 6, 16  # conv channel counts
_N_CLASSES = 2    # fc3 out_features


def _round_up(n, m):
    return ((n + m - 1) // m) * m


# -----------------------------------------------------------------------------
# Kernel: one grid step = one image; everything VMEM resident.
# Activation layout: rows = conv output row (sublanes), lanes = c*W' + w
# (channel-major).
# -----------------------------------------------------------------------------
def _net_kernel(x_ref, m1_ref, b1_ref, m2_ref, b2_ref,
                w01_ref, bf1_ref, wf2_ref, bf2_ref, wf3_ref, bf3_ref,
                out_ref):
    f32, bf16 = jnp.float32, jnp.bfloat16
    K = m1_ref.shape[0]
    H = x_ref.shape[0]
    H1 = H - K + 1                      # conv1 output rows
    L1 = m1_ref.shape[2]                # conv1 output lanes (padded to 128)
    L2 = m2_ref.shape[2]                # conv2 output lanes (padded to 128)
    Hp1 = H1 // 2
    H2 = Hp1 - K + 1                    # valid conv2 output rows
    H2x = 2 * H2 - 1                    # conv2 rows incl. junk odd rows
    Hp2 = w01_ref.shape[0]
    F1 = w01_ref.shape[2]

    def mm(a, b):                       # bf16 x bf16 matmul, f32 accumulate
        return jnp.dot(a.astype(bf16), b, preferred_element_type=f32)

    # conv1 + bias + relu: K accumulated banded matmuls (vertical tap di is a
    # static row slice; horizontal taps + channel fan-out live in m1[di]).
    x = x_ref[...]
    acc = jnp.zeros((H1, L1), f32)
    for di in range(K):
        acc = acc + mm(x[di:di + H1, :], m1_ref[di])
    o1 = jnp.maximum(acc + b1_ref[...], 0.0)             # (H1, L1)

    # maxpool1 2x2 on the VPU (pair maxima via shifted slices).  Valid pooled
    # values sit at even rows / even within-channel lanes; the sub-sampling is
    # folded into conv2 (LHS row offsets 2*di, zero rows in m2 at odd lanes).
    c1 = jnp.maximum(o1[:, :L1 - 1], o1[:, 1:])          # (H1,   L1-1)
    r1 = jnp.maximum(c1[:H1 - 1, :], c1[1:, :])          # (H1-1, L1-1)

    # conv2 + bias + relu over 2*H2-1 rows (odd rows are junk and are dropped
    # by the static row selection in pool2/fc1 below).
    acc = jnp.zeros((H2x, L2), f32)
    for di in range(K):
        acc = acc + mm(r1[2 * di:2 * di + H2x, :], m2_ref[di])
    o2 = jnp.maximum(acc + b2_ref[...], 0.0)             # (H2x, L2)

    # maxpool2 2x2 (valid pooled value for output row p ends up at row 4*p).
    c2 = jnp.maximum(o2[:, :L2 - 1], o2[:, 1:])          # (H2x,   L2-1)
    r2 = jnp.maximum(c2[:H2x - 2, :], c2[2:, :])         # (H2x-2, L2-1)

    # fc1 + relu.  The NCHW .view(-1, feat) flatten and pool2's lane
    # sub-sampling are folded into w01[p]; pool2's row sub-sampling is the
    # static 4*p row slice.
    h = jnp.zeros((1, F1), f32)
    for p in range(Hp2):
        h = h + mm(r2[4 * p:4 * p + 1, :], w01_ref[p])
    h = jnp.maximum(h + bf1_ref[...], 0.0)               # (1, F1)

    # fc2 + relu.
    h = jnp.maximum(mm(h, wf2_ref[...]) + bf2_ref[...], 0.0)

    # TODO(synk): F.dropout is eval-mode identity here (no training-mode mask).
    # fc3 (output padded to 128 lanes; wrapper slices the first 2).
    out_ref[...] = (mm(h, wf3_ref[...]) + bf3_ref[...]).astype(out_ref.dtype)


# -----------------------------------------------------------------------------
# One-time packing of the Net weights into matmul-ready, lane-padded operands.
# -----------------------------------------------------------------------------
_PACK_ORDER = ("m1", "b1", "m2", "b2", "w01", "bf1", "wf2", "bf2", "wf3", "bf3")


def pack_params(params, H, W):
    K, C1, C2 = _K, _C1, _C2
    H1, W1 = H - K + 1, W - K + 1
    Hp1, Wp1 = H1 // 2, W1 // 2
    H2, W2 = Hp1 - K + 1, Wp1 - K + 1
    Hp2, Wp2 = H2 // 2, W2 // 2
    assert min(H1, W1, H2, W2, Hp2, Wp2) > 0

    w1 = np.asarray(params["conv1_w"], np.float32)
    b1 = np.asarray(params["conv1_b"], np.float32)
    w2 = np.asarray(params["conv2_w"], np.float32)
    b2 = np.asarray(params["conv2_b"], np.float32)
    wf1 = np.asarray(params["fc1_w"], np.float32)
    bf1 = np.asarray(params["fc1_b"], np.float32)
    wf2 = np.asarray(params["fc2_w"], np.float32)
    bf2 = np.asarray(params["fc2_b"], np.float32)
    wf3 = np.asarray(params["fc3_w"], np.float32)
    bf3 = np.asarray(params["fc3_b"], np.float32)

    L1 = _round_up(C1 * W1, 128)        # conv1 lanes (channel-major c*W1 + w)
    L2 = _round_up(C2 * W2, 128)        # conv2 lanes (channel-major c*W2 + j)
    F1 = _round_up(wf1.shape[1], 128)   # fc1 out 360 -> 384
    F2 = _round_up(wf2.shape[1], 128)   # fc2 out  84 -> 128
    NO = _round_up(wf3.shape[1], 128)   # fc3 out   2 -> 128

    # conv1 band matrices: m1[di][j+dj, c*W1 + j] = w1[c, 0, di, dj].
    m1 = np.zeros((K, W, L1), np.float32)
    for di in range(K):
        for dj in range(K):
            for j in range(W1):
                m1[di, j + dj, np.arange(C1) * W1 + j] = w1[:, 0, di, dj]
    b1r = np.zeros((1, L1), np.float32)
    b1r[0, :C1 * W1] = np.repeat(b1, W1)

    # conv2 band matrices with pool1 lane sub-sampling folded in:
    # m2[di][ci*W1 + 2*(j+dj), co*W2 + j] = w2[co, ci, di, dj]  (odd rows = 0).
    m2 = np.zeros((K, L1 - 1, L2), np.float32)
    for di in range(K):
        for dj in range(K):
            for j in range(W2):
                for ci in range(C1):
                    m2[di, ci * W1 + 2 * (j + dj),
                       np.arange(C2) * W2 + j] = w2[:, ci, di, dj]
    b2r = np.zeros((1, L2), np.float32)
    b2r[0, :C2 * W2] = np.repeat(b2, W2)

    # fc1 weight slabs: NCHW flatten f = c*Hp2*Wp2 + p*Wp2 + q plus pool2's
    # lane sub-sampling (row co*W2 + 2q) folded in; one slab per pooled row p.
    w01 = np.zeros((Hp2, L2 - 1, F1), np.float32)
    for p in range(Hp2):
        for q in range(Wp2):
            for c in range(C2):
                w01[p, c * W2 + 2 * q, :wf1.shape[1]] = \
                    wf1[c * Hp2 * Wp2 + p * Wp2 + q, :]
    bf1r = np.zeros((1, F1), np.float32)
    bf1r[0, :bf1.shape[0]] = bf1

    wf2p = np.zeros((F1, F2), np.float32)
    wf2p[:wf2.shape[0], :wf2.shape[1]] = wf2
    bf2r = np.zeros((1, F2), np.float32)
    bf2r[0, :bf2.shape[0]] = bf2

    wf3p = np.zeros((F2, NO), np.float32)
    wf3p[:wf3.shape[0], :wf3.shape[1]] = wf3
    bf3r = np.zeros((1, NO), np.float32)
    bf3r[0, :bf3.shape[0]] = bf3

    bf16 = jnp.bfloat16
    return {
        "m1": jnp.asarray(m1, bf16), "b1": jnp.asarray(b1r),
        "m2": jnp.asarray(m2, bf16), "b2": jnp.asarray(b2r),
        "w01": jnp.asarray(w01, bf16), "bf1": jnp.asarray(bf1r),
        "wf2": jnp.asarray(wf2p, bf16), "bf2": jnp.asarray(bf2r),
        "wf3": jnp.asarray(wf3p, bf16), "bf3": jnp.asarray(bf3r),
    }


# -----------------------------------------------------------------------------
# Forward pass wrapper: grid over the batch, full-array VMEM blocks for the
# (batch-invariant) packed weights.
# -----------------------------------------------------------------------------
def _bcast_spec(shape):
    nd = len(shape)
    return pl.BlockSpec(shape, lambda b, _nd=nd: (0,) * _nd)


def net_forward(x, packed):
    """x: (B, 1, H, W) float32 NCHW.  Returns (B, 2) float32 logits."""
    B, _, H, W = x.shape
    x3 = x.astype(jnp.float32).reshape(B, H, W)            # Cin == 1
    weights = tuple(packed[k] for k in _PACK_ORDER)
    no = packed["wf3"].shape[1]
    out = pl.pallas_call(
        _net_kernel,
        out_shape=jax.ShapeDtypeStruct((B, 1, no), jnp.float32),
        grid=(B,),
        in_specs=[pl.BlockSpec((None, H, W), lambda b: (b, 0, 0))]
                 + [_bcast_spec(w.shape) for w in weights],
        out_specs=pl.BlockSpec((None, 1, no), lambda b: (b, 0, 0)),
        compiler_params=pltpu.CompilerParams(
            dimension_semantics=("parallel",)),
    )(x3, *weights)
    return out[:, 0, :_N_CLASSES]


# -----------------------------------------------------------------------------
# Parameters (deterministic, PyTorch-default-style uniform init).
# -----------------------------------------------------------------------------
def init_params(key, fc1_in):
    keys = jax.random.split(key, 10)

    def u(k, shape, fan_in):
        bound = 1.0 / jnp.sqrt(jnp.float32(fan_in))
        return jax.random.uniform(k, shape, jnp.float32, -bound, bound)

    return {
        "conv1_w": u(keys[0], (_C1, 1, _K, _K), 1 * _K * _K),
        "conv1_b": u(keys[1], (_C1,), 1 * _K * _K),
        "conv2_w": u(keys[2], (_C2, _C1, _K, _K), _C1 * _K * _K),
        "conv2_b": u(keys[3], (_C2,), _C1 * _K * _K),
        "fc1_w": u(keys[4], (fc1_in, 360), fc1_in),
        "fc1_b": u(keys[5], (360,), fc1_in),
        "fc2_w": u(keys[6], (360, 84), 360),
        "fc2_b": u(keys[7], (84,), 360),
        "fc3_w": u(keys[8], (84, _N_CLASSES), 84),
        "fc3_b": u(keys[9], (_N_CLASSES,), 84),
    }


# -----------------------------------------------------------------------------
# Plain-JAX (XLA) reference, used only for in-script numerical validation.
# -----------------------------------------------------------------------------
def _ref_conv(x, w, b):
    B, Cin, H, W = x.shape
    Cout, _, k, _ = w.shape
    Ho, Wo = H - k + 1, W - k + 1
    patches = jnp.stack([x[:, :, di:di + Ho, dj:dj + Wo]
                         for di in range(k) for dj in range(k)], axis=2)
    out = jnp.einsum("bcpij,ocp->boij", patches, w.reshape(Cout, Cin, k * k),
                     precision=jax.lax.Precision.HIGHEST)
    return out + b[None, :, None, None]


def _ref_pool(x):
    B, C, H, W = x.shape
    return x.reshape(B, C, H // 2, 2, W // 2, 2).max(axis=(3, 5))


def net_reference(x, params):
    hp = jax.lax.Precision.HIGHEST
    h = _ref_pool(jax.nn.relu(_ref_conv(x, params["conv1_w"], params["conv1_b"])))
    h = _ref_pool(jax.nn.relu(_ref_conv(h, params["conv2_w"], params["conv2_b"])))
    h = h.reshape(h.shape[0], -1)
    h = jax.nn.relu(jnp.dot(h, params["fc1_w"], precision=hp) + params["fc1_b"])
    h = jax.nn.relu(jnp.dot(h, params["fc2_w"], precision=hp) + params["fc2_b"])
    return jnp.dot(h, params["fc3_w"], precision=hp) + params["fc3_b"]


if __name__ == "__main__":
    key = jax.random.PRNGKey(0)
    k_in, k_par = jax.random.split(key)

    # 20x20 -> conv1 16x16 -> pool 8x8 -> conv2 4x4 -> pool 2x2 (floor mode).
    B, H, W = 2, 20, 20
    Hp2 = ((H - _K + 1) // 2 - _K + 1) // 2
    Wp2 = ((W - _K + 1) // 2 - _K + 1) // 2
    fc1_in = _C2 * Hp2 * Wp2                      # = 64 (see fc1 TODO at top)

    x = jax.random.normal(k_in, (B, 1, H, W), jnp.float32)
    params = init_params(k_par, fc1_in)
    packed = pack_params(params, H, W)            # one-time weight packing

    out = jax.jit(net_forward)(x, packed)
    out = jax.block_until_ready(out)
    assert out.shape == (B, _N_CLASSES), out.shape

    # Numerical sanity check vs. a plain-XLA f32 reference (tolerance absorbs
    # the bf16 operand quantization inside the Pallas dots; pooling/relu are
    # exact now that they run on the VPU).
    ref = net_reference(x, params)
    np.testing.assert_allclose(np.asarray(out), np.asarray(ref),
                               rtol=5e-2, atol=5e-2)
    print("KERNEL_OK")
</pallas_src>

<mosaic_0001>
module attributes {stable_mosaic.version = 11 : i64} {
  func.func @_net_kernel(%arg0: i32, %arg1: memref<1x20x20xf32, #tpu.memory_space<vmem>>, %arg2: memref<5x20x128xbf16, #tpu.memory_space<vmem>>, %arg3: memref<1x128xf32, #tpu.memory_space<vmem>>, %arg4: memref<5x127x128xbf16, #tpu.memory_space<vmem>>, %arg5: memref<1x128xf32, #tpu.memory_space<vmem>>, %arg6: memref<2x127x384xbf16, #tpu.memory_space<vmem>>, %arg7: memref<1x384xf32, #tpu.memory_space<vmem>>, %arg8: memref<384x128xbf16, #tpu.memory_space<vmem>>, %arg9: memref<1x128xf32, #tpu.memory_space<vmem>>, %arg10: memref<128x128xbf16, #tpu.memory_space<vmem>>, %arg11: memref<1x128xf32, #tpu.memory_space<vmem>>, %arg12: memref<1x1x128xf32, #tpu.memory_space<vmem>>) attributes {dimension_semantics = [#tpu.dimension_semantics<parallel>], iteration_bounds = array<i64: 2>, scalar_prefetch = 0 : i64, scratch_operands = 0 : i64, tpu.core_type = #tpu.core_type<tc>, window_params = [{transform_indices = @transform_0, window_bounds = array<i64: 1, 20, 20>}, {pipeline_mode = #tpu.pipeline_mode<synchronous>, transform_indices = @transform_1, window_bounds = array<i64: 5, 20, 128>}, {pipeline_mode = #tpu.pipeline_mode<synchronous>, transform_indices = @transform_2, window_bounds = array<i64: 1, 128>}, {pipeline_mode = #tpu.pipeline_mode<synchronous>, transform_indices = @transform_3, window_bounds = array<i64: 5, 127, 128>}, {pipeline_mode = #tpu.pipeline_mode<synchronous>, transform_indices = @transform_4, window_bounds = array<i64: 1, 128>}, {pipeline_mode = #tpu.pipeline_mode<synchronous>, transform_indices = @transform_5, window_bounds = array<i64: 2, 127, 384>}, {pipeline_mode = #tpu.pipeline_mode<synchronous>, transform_indices = @transform_6, window_bounds = array<i64: 1, 384>}, {pipeline_mode = #tpu.pipeline_mode<synchronous>, transform_indices = @transform_7, window_bounds = array<i64: 384, 128>}, {pipeline_mode = #tpu.pipeline_mode<synchronous>, transform_indices = @transform_8, window_bounds = array<i64: 1, 128>}, {pipeline_mode = #tpu.pipeline_mode<synchronous>, transform_indices = @transform_9, window_bounds = array<i64: 128, 128>}, {pipeline_mode = #tpu.pipeline_mode<synchronous>, transform_indices = @transform_10, window_bounds = array<i64: 1, 128>}, {transform_indices = @transform_11, window_bounds = array<i64: 1, 1, 128>}]} {
    %c0 = arith.constant 0 : index
    %c0_0 = arith.constant 0 : index
    %c0_1 = arith.constant 0 : index
    %0 = vector.load %arg1[%c0, %c0_0, %c0_1] : memref<1x20x20xf32, #tpu.memory_space<vmem>>, vector<1x20x20xf32>
    %1 = vector.shape_cast %0 : vector<1x20x20xf32> to vector<20x20xf32>
    %cst = arith.constant 0.000000e+00 : f32
    %2 = vector.broadcast %cst : f32 to vector<16x128xf32>
    %3 = vector.extract_strided_slice %1 {offsets = [0, 0], sizes = [16, 20], strides = [1, 1]} : vector<20x20xf32> to vector<16x20xf32>
    %c0_2 = arith.constant 0 : index
    %c0_3 = arith.constant 0 : index
    %c0_4 = arith.constant 0 : index
    %4 = vector.load %arg2[%c0_2, %c0_3, %c0_4] : memref<5x20x128xbf16, #tpu.memory_space<vmem>>, vector<1x20x128xbf16>
    %5 = vector.shape_cast %4 : vector<1x20x128xbf16> to vector<20x128xbf16>
    %6 = arith.truncf %3 : vector<16x20xf32> to vector<16x20xbf16>
    %cst_5 = arith.constant dense<0.000000e+00> : vector<16x128xf32>
    %7 = tpu.matmul %6, %5, %cst_5 {dimension_numbers = #tpu.dot_dimension_numbers<[1], [0], [0], [1], [0, 0, 1, 1], [], []>} : vector<16x20xbf16>, vector<20x128xbf16>, vector<16x128xf32> -> vector<16x128xf32>
    %8 = arith.addf %2, %7 : vector<16x128xf32>
    %9 = vector.extract_strided_slice %1 {offsets = [1, 0], sizes = [16, 20], strides = [1, 1]} : vector<20x20xf32> to vector<16x20xf32>
    %c1 = arith.constant 1 : index
    %c0_6 = arith.constant 0 : index
    %c0_7 = arith.constant 0 : index
    %10 = vector.load %arg2[%c1, %c0_6, %c0_7] : memref<5x20x128xbf16, #tpu.memory_space<vmem>>, vector<1x20x128xbf16>
    %11 = vector.shape_cast %10 : vector<1x20x128xbf16> to vector<20x128xbf16>
    %12 = arith.truncf %9 : vector<16x20xf32> to vector<16x20xbf16>
    %cst_8 = arith.constant dense<0.000000e+00> : vector<16x128xf32>
    %13 = tpu.matmul %12, %11, %cst_8 {dimension_numbers = #tpu.dot_dimension_numbers<[1], [0], [0], [1], [0, 0, 1, 1], [], []>} : vector<16x20xbf16>, vector<20x128xbf16>, vector<16x128xf32> -> vector<16x128xf32>
    %14 = arith.addf %8, %13 : vector<16x128xf32>
    %15 = vector.extract_strided_slice %1 {offsets = [2, 0], sizes = [16, 20], strides = [1, 1]} : vector<20x20xf32> to vector<16x20xf32>
    %c2 = arith.constant 2 : index
    %c0_9 = arith.constant 0 : index
    %c0_10 = arith.constant 0 : index
    %16 = vector.load %arg2[%c2, %c0_9, %c0_10] : memref<5x20x128xbf16, #tpu.memory_space<vmem>>, vector<1x20x128xbf16>
    %17 = vector.shape_cast %16 : vector<1x20x128xbf16> to vector<20x128xbf16>
    %18 = arith.truncf %15 : vector<16x20xf32> to vector<16x20xbf16>
    %cst_11 = arith.constant dense<0.000000e+00> : vector<16x128xf32>
    %19 = tpu.matmul %18, %17, %cst_11 {dimension_numbers = #tpu.dot_dimension_numbers<[1], [0], [0], [1], [0, 0, 1, 1], [], []>} : vector<16x20xbf16>, vector<20x128xbf16>, vector<16x128xf32> -> vector<16x128xf32>
    %20 = arith.addf %14, %19 : vector<16x128xf32>
    %21 = vector.extract_strided_slice %1 {offsets = [3, 0], sizes = [16, 20], strides = [1, 1]} : vector<20x20xf32> to vector<16x20xf32>
    %c3 = arith.constant 3 : index
    %c0_12 = arith.constant 0 : index
    %c0_13 = arith.constant 0 : index
    %22 = vector.load %arg2[%c3, %c0_12, %c0_13] : memref<5x20x128xbf16, #tpu.memory_space<vmem>>, vector<1x20x128xbf16>
    %23 = vector.shape_cast %22 : vector<1x20x128xbf16> to vector<20x128xbf16>
    %24 = arith.truncf %21 : vector<16x20xf32> to vector<16x20xbf16>
    %cst_14 = arith.constant dense<0.000000e+00> : vector<16x128xf32>
    %25 = tpu.matmul %24, %23, %cst_14 {dimension_numbers = #tpu.dot_dimension_numbers<[1], [0], [0], [1], [0, 0, 1, 1], [], []>} : vector<16x20xbf16>, vector<20x128xbf16>, vector<16x128xf32> -> vector<16x128xf32>
    %26 = arith.addf %20, %25 : vector<16x128xf32>
    %27 = vector.extract_strided_slice %1 {offsets = [4, 0], sizes = [16, 20], strides = [1, 1]} : vector<20x20xf32> to vector<16x20xf32>
    %c4 = arith.constant 4 : index
    %c0_15 = arith.constant 0 : index
    %c0_16 = arith.constant 0 : index
    %28 = vector.load %arg2[%c4, %c0_15, %c0_16] : memref<5x20x128xbf16, #tpu.memory_space<vmem>>, vector<1x20x128xbf16>
    %29 = vector.shape_cast %28 : vector<1x20x128xbf16> to vector<20x128xbf16>
    %30 = arith.truncf %27 : vector<16x20xf32> to vector<16x20xbf16>
    %cst_17 = arith.constant dense<0.000000e+00> : vector<16x128xf32>
    %31 = tpu.matmul %30, %29, %cst_17 {dimension_numbers = #tpu.dot_dimension_numbers<[1], [0], [0], [1], [0, 0, 1, 1], [], []>} : vector<16x20xbf16>, vector<20x128xbf16>, vector<16x128xf32> -> vector<16x128xf32>
    %32 = arith.addf %26, %31 : vector<16x128xf32>
    %c0_18 = arith.constant 0 : index
    %c0_19 = arith.constant 0 : index
    %33 = vector.load %arg3[%c0_18, %c0_19] : memref<1x128xf32, #tpu.memory_space<vmem>>, vector<1x128xf32>
    %34 = vector.broadcast %33 : vector<1x128xf32> to vector<16x128xf32>
    %35 = arith.addf %32, %34 : vector<16x128xf32>
    %cst_20 = arith.constant 0.000000e+00 : f32
    %36 = vector.broadcast %cst_20 : f32 to vector<16x128xf32>
    %37 = arith.maximumf %35, %36 : vector<16x128xf32>
    %38 = vector.extract_strided_slice %37 {offsets = [0, 0], sizes = [16, 127], strides = [1, 1]} : vector<16x128xf32> to vector<16x127xf32>
    %39 = vector.extract_strided_slice %37 {offsets = [0, 1], sizes = [16, 127], strides = [1, 1]} : vector<16x128xf32> to vector<16x127xf32>
    %40 = arith.maximumf %38, %39 : vector<16x127xf32>
    %41 = vector.extract_strided_slice %40 {offsets = [0, 0], sizes = [15, 127], strides = [1, 1]} : vector<16x127xf32> to vector<15x127xf32>
    %42 = vector.extract_strided_slice %40 {offsets = [1, 0], sizes = [15, 127], strides = [1, 1]} : vector<16x127xf32> to vector<15x127xf32>
    %43 = arith.maximumf %41, %42 : vector<15x127xf32>
    %cst_21 = arith.constant 0.000000e+00 : f32
    %44 = vector.broadcast %cst_21 : f32 to vector<7x128xf32>
    %45 = vector.extract_strided_slice %43 {offsets = [0, 0], sizes = [7, 127], strides = [1, 1]} : vector<15x127xf32> to vector<7x127xf32>
    %c0_22 = arith.constant 0 : index
    %c0_23 = arith.constant 0 : index
    %c0_24 = arith.constant 0 : index
    %46 = vector.load %arg4[%c0_22, %c0_23, %c0_24] : memref<5x127x128xbf16, #tpu.memory_space<vmem>>, vector<1x127x128xbf16>
    %47 = vector.shape_cast %46 : vector<1x127x128xbf16> to vector<127x128xbf16>
    %48 = arith.truncf %45 : vector<7x127xf32> to vector<7x127xbf16>
    %cst_25 = arith.constant dense<0.000000e+00> : vector<7x128xf32>
    %49 = tpu.matmul %48, %47, %cst_25 {dimension_numbers = #tpu.dot_dimension_numbers<[1], [0], [0], [1], [0, 0, 1, 1], [], []>} : vector<7x127xbf16>, vector<127x128xbf16>, vector<7x128xf32> -> vector<7x128xf32>
    %50 = arith.addf %44, %49 : vector<7x128xf32>
    %51 = vector.extract_strided_slice %43 {offsets = [2, 0], sizes = [7, 127], strides = [1, 1]} : vector<15x127xf32> to vector<7x127xf32>
    %c1_26 = arith.constant 1 : index
    %c0_27 = arith.constant 0 : index
    %c0_28 = arith.constant 0 : index
    %52 = vector.load %arg4[%c1_26, %c0_27, %c0_28] : memref<5x127x128xbf16, #tpu.memory_space<vmem>>, vector<1x127x128xbf16>
    %53 = vector.shape_cast %52 : vector<1x127x128xbf16> to vector<127x128xbf16>
    %54 = arith.truncf %51 : vector<7x127xf32> to vector<7x127xbf16>
    %cst_29 = arith.constant dense<0.000000e+00> : vector<7x128xf32>
    %55 = tpu.matmul %54, %53, %cst_29 {dimension_numbers = #tpu.dot_dimension_numbers<[1], [0], [0], [1], [0, 0, 1, 1], [], []>} : vector<7x127xbf16>, vector<127x128xbf16>, vector<7x128xf32> -> vector<7x128xf32>
    %56 = arith.addf %50, %55 : vector<7x128xf32>
    %57 = vector.extract_strided_slice %43 {offsets = [4, 0], sizes = [7, 127], strides = [1, 1]} : vector<15x127xf32> to vector<7x127xf32>
    %c2_30 = arith.constant 2 : index
    %c0_31 = arith.constant 0 : index
    %c0_32 = arith.constant 0 : index
    %58 = vector.load %arg4[%c2_30, %c0_31, %c0_32] : memref<5x127x128xbf16, #tpu.memory_space<vmem>>, vector<1x127x128xbf16>
    %59 = vector.shape_cast %58 : vector<1x127x128xbf16> to vector<127x128xbf16>
    %60 = arith.truncf %57 : vector<7x127xf32> to vector<7x127xbf16>
    %cst_33 = arith.constant dense<0.000000e+00> : vector<7x128xf32>
    %61 = tpu.matmul %60, %59, %cst_33 {dimension_numbers = #tpu.dot_dimension_numbers<[1], [0], [0], [1], [0, 0, 1, 1], [], []>} : vector<7x127xbf16>, vector<127x128xbf16>, vector<7x128xf32> -> vector<7x128xf32>
    %62 = arith.addf %56, %61 : vector<7x128xf32>
    %63 = vector.extract_strided_slice %43 {offsets = [6, 0], sizes = [7, 127], strides = [1, 1]} : vector<15x127xf32> to vector<7x127xf32>
    %c3_34 = arith.constant 3 : index
    %c0_35 = arith.constant 0 : index
    %c0_36 = arith.constant 0 : index
    %64 = vector.load %arg4[%c3_34, %c0_35, %c0_36] : memref<5x127x128xbf16, #tpu.memory_space<vmem>>, vector<1x127x128xbf16>
    %65 = vector.shape_cast %64 : vector<1x127x128xbf16> to vector<127x128xbf16>
    %66 = arith.truncf %63 : vector<7x127xf32> to vector<7x127xbf16>
    %cst_37 = arith.constant dense<0.000000e+00> : vector<7x128xf32>
    %67 = tpu.matmul %66, %65, %cst_37 {dimension_numbers = #tpu.dot_dimension_numbers<[1], [0], [0], [1], [0, 0, 1, 1], [], []>} : vector<7x127xbf16>, vector<127x128xbf16>, vector<7x128xf32> -> vector<7x128xf32>
    %68 = arith.addf %62, %67 : vector<7x128xf32>
    %69 = vector.extract_strided_slice %43 {offsets = [8, 0], sizes = [7, 127], strides = [1, 1]} : vector<15x127xf32> to vector<7x127xf32>
    %c4_38 = arith.constant 4 : index
    %c0_39 = arith.constant 0 : index
    %c0_40 = arith.constant 0 : index
    %70 = vector.load %arg4[%c4_38, %c0_39, %c0_40] : memref<5x127x128xbf16, #tpu.memory_space<vmem>>, vector<1x127x128xbf16>
    %71 = vector.shape_cast %70 : vector<1x127x128xbf16> to vector<127x128xbf16>
    %72 = arith.truncf %69 : vector<7x127xf32> to vector<7x127xbf16>
    %cst_41 = arith.constant dense<0.000000e+00> : vector<7x128xf32>
    %73 = tpu.matmul %72, %71, %cst_41 {dimension_numbers = #tpu.dot_dimension_numbers<[1], [0], [0], [1], [0, 0, 1, 1], [], []>} : vector<7x127xbf16>, vector<127x128xbf16>, vector<7x128xf32> -> vector<7x128xf32>
    %74 = arith.addf %68, %73 : vector<7x128xf32>
    %c0_42 = arith.constant 0 : index
    %c0_43 = arith.constant 0 : index
    %75 = vector.load %arg5[%c0_42, %c0_43] : memref<1x128xf32, #tpu.memory_space<vmem>>, vector<1x128xf32>
    %76 = vector.broadcast %75 : vector<1x128xf32> to vector<7x128xf32>
    %77 = arith.addf %74, %76 : vector<7x128xf32>
    %cst_44 = arith.constant 0.000000e+00 : f32
    %78 = vector.broadcast %cst_44 : f32 to vector<7x128xf32>
    %79 = arith.maximumf %77, %78 : vector<7x128xf32>
    %80 = vector.extract_strided_slice %79 {offsets = [0, 0], sizes = [7, 127], strides = [1, 1]} : vector<7x128xf32> to vector<7x127xf32>
    %81 = vector.extract_strided_slice %79 {offsets = [0, 1], sizes = [7, 127], strides = [1, 1]} : vector<7x128xf32> to vector<7x127xf32>
    %82 = arith.maximumf %80, %81 : vector<7x127xf32>
    %83 = vector.extract_strided_slice %82 {offsets = [0, 0], sizes = [5, 127], strides = [1, 1]} : vector<7x127xf32> to vector<5x127xf32>
    %84 = vector.extract_strided_slice %82 {offsets = [2, 0], sizes = [5, 127], strides = [1, 1]} : vector<7x127xf32> to vector<5x127xf32>
    %85 = arith.maximumf %83, %84 : vector<5x127xf32>
    %cst_45 = arith.constant 0.000000e+00 : f32
    %86 = vector.broadcast %cst_45 : f32 to vector<1x384xf32>
    %87 = vector.extract_strided_slice %85 {offsets = [0, 0], sizes = [1, 127], strides = [1, 1]} : vector<5x127xf32> to vector<1x127xf32>
    %c0_46 = arith.constant 0 : index
    %c0_47 = arith.constant 0 : index
    %c0_48 = arith.constant 0 : index
    %88 = vector.load %arg6[%c0_46, %c0_47, %c0_48] : memref<2x127x384xbf16, #tpu.memory_space<vmem>>, vector<1x127x384xbf16>
    %89 = vector.shape_cast %88 : vector<1x127x384xbf16> to vector<127x384xbf16>
    %90 = arith.truncf %87 : vector<1x127xf32> to vector<1x127xbf16>
    %cst_49 = arith.constant dense<0.000000e+00> : vector<1x384xf32>
    %91 = tpu.matmul %90, %89, %cst_49 {dimension_numbers = #tpu.dot_dimension_numbers<[1], [0], [0], [1], [0, 0, 1, 1], [], []>} : vector<1x127xbf16>, vector<127x384xbf16>, vector<1x384xf32> -> vector<1x384xf32>
    %92 = arith.addf %86, %91 : vector<1x384xf32>
    %93 = vector.extract_strided_slice %85 {offsets = [4, 0], sizes = [1, 127], strides = [1, 1]} : vector<5x127xf32> to vector<1x127xf32>
    %c1_50 = arith.constant 1 : index
    %c0_51 = arith.constant 0 : index
    %c0_52 = arith.constant 0 : index
    %94 = vector.load %arg6[%c1_50, %c0_51, %c0_52] : memref<2x127x384xbf16, #tpu.memory_space<vmem>>, vector<1x127x384xbf16>
    %95 = vector.shape_cast %94 : vector<1x127x384xbf16> to vector<127x384xbf16>
    %96 = arith.truncf %93 : vector<1x127xf32> to vector<1x127xbf16>
    %cst_53 = arith.constant dense<0.000000e+00> : vector<1x384xf32>
    %97 = tpu.matmul %96, %95, %cst_53 {dimension_numbers = #tpu.dot_dimension_numbers<[1], [0], [0], [1], [0, 0, 1, 1], [], []>} : vector<1x127xbf16>, vector<127x384xbf16>, vector<1x384xf32> -> vector<1x384xf32>
    %98 = arith.addf %92, %97 : vector<1x384xf32>
    %c0_54 = arith.constant 0 : index
    %c0_55 = arith.constant 0 : index
    %99 = vector.load %arg7[%c0_54, %c0_55] : memref<1x384xf32, #tpu.memory_space<vmem>>, vector<1x384xf32>
    %100 = arith.addf %98, %99 : vector<1x384xf32>
    %cst_56 = arith.constant 0.000000e+00 : f32
    %101 = vector.broadcast %cst_56 : f32 to vector<1x384xf32>
    %102 = arith.maximumf %100, %101 : vector<1x384xf32>
    %c0_57 = arith.constant 0 : index
    %c0_58 = arith.constant 0 : index
    %103 = vector.load %arg8[%c0_57, %c0_58] : memref<384x128xbf16, #tpu.memory_space<vmem>>, vector<384x128xbf16>
    %104 = arith.truncf %102 : vector<1x384xf32> to vector<1x384xbf16>
    %cst_59 = arith.constant dense<0.000000e+00> : vector<1x128xf32>
    %105 = tpu.matmul %104, %103, %cst_59 {dimension_numbers = #tpu.dot_dimension_numbers<[1], [0], [0], [1], [0, 0, 1, 1], [], []>} : vector<1x384xbf16>, vector<384x128xbf16>, vector<1x128xf32> -> vector<1x128xf32>
    %c0_60 = arith.constant 0 : index
    %c0_61 = arith.constant 0 : index
    %106 = vector.load %arg9[%c0_60, %c0_61] : memref<1x128xf32, #tpu.memory_space<vmem>>, vector<1x128xf32>
    %107 = arith.addf %105, %106 : vector<1x128xf32>
    %cst_62 = arith.constant 0.000000e+00 : f32
    %108 = vector.broadcast %cst_62 : f32 to vector<1x128xf32>
    %109 = arith.maximumf %107, %108 : vector<1x128xf32>
    %c0_63 = arith.constant 0 : index
    %c0_64 = arith.constant 0 : index
    %110 = vector.load %arg10[%c0_63, %c0_64] : memref<128x128xbf16, #tpu.memory_space<vmem>>, vector<128x128xbf16>
    %111 = arith.truncf %109 : vector<1x128xf32> to vector<1x128xbf16>
    %cst_65 = arith.constant dense<0.000000e+00> : vector<1x128xf32>
    %112 = tpu.matmul %111, %110, %cst_65 {dimension_numbers = #tpu.dot_dimension_numbers<[1], [0], [0], [1], [0, 0, 1, 1], [], []>} : vector<1x128xbf16>, vector<128x128xbf16>, vector<1x128xf32> -> vector<1x128xf32>
    %c0_66 = arith.constant 0 : index
    %c0_67 = arith.constant 0 : index
    %113 = vector.load %arg11[%c0_66, %c0_67] : memref<1x128xf32, #tpu.memory_space<vmem>>, vector<1x128xf32>
    %114 = arith.addf %112, %113 : vector<1x128xf32>
    %c0_68 = arith.constant 0 : index
    %c0_69 = arith.constant 0 : index
    %c0_70 = arith.constant 0 : index
    %115 = vector.load %arg12[%c0_68, %c0_69, %c0_70] : memref<1x1x128xf32, #tpu.memory_space<vmem>>, vector<1x1x128xf32>
    %116 = vector.shape_cast %115 : vector<1x1x128xf32> to vector<1x128xf32>
    %117 = vector.shape_cast %114 : vector<1x128xf32> to vector<1x1x128xf32>
    tpu.vector_store %arg12[%c0_68, %c0_69, %c0_70], %117 {strides = array<i32>} : memref<1x1x128xf32, #tpu.memory_space<vmem>>, vector<1x1x128xf32>,
    return
  }
  func.func @transform_0(%arg0: i32) -> (i32, i32, i32) {
    %c0_i32 = arith.constant 0 : i32
    %c0_i32_0 = arith.constant 0 : i32
    %c0_i32_1 = arith.constant 0 : i32
    return %arg0, %c0_i32, %c0_i32_0 : i32, i32, i32
  }
  func.func @transform_1(%arg0: i32) -> (i32, i32, i32) {
    %c0_i32 = arith.constant 0 : i32
    %c0_i32_0 = arith.constant 0 : i32
    %c0_i32_1 = arith.constant 0 : i32
    %c0_i32_2 = arith.constant 0 : i32
    return %c0_i32, %c0_i32_0, %c0_i32_1 : i32, i32, i32
  }
  func.func @transform_2(%arg0: i32) -> (i32, i32) {
    %c0_i32 = arith.constant 0 : i32
    %c0_i32_0 = arith.constant 0 : i32
    %c0_i32_1 = arith.constant 0 : i32
    return %c0_i32, %c0_i32_0 : i32, i32
  }
  func.func @transform_3(%arg0: i32) -> (i32, i32, i32) {
    %c0_i32 = arith.constant 0 : i32
    %c0_i32_0 = arith.constant 0 : i32
    %c0_i32_1 = arith.constant 0 : i32
    %c0_i32_2 = arith.constant 0 : i32
    return %c0_i32, %c0_i32_0, %c0_i32_1 : i32, i32, i32
  }
  func.func @transform_4(%arg0: i32) -> (i32, i32) {
    %c0_i32 = arith.constant 0 : i32
    %c0_i32_0 = arith.constant 0 : i32
    %c0_i32_1 = arith.constant 0 : i32
    return %c0_i32, %c0_i32_0 : i32, i32
  }
  func.func @transform_5(%arg0: i32) -> (i32, i32, i32) {
    %c0_i32 = arith.constant 0 : i32
    %c0_i32_0 = arith.constant 0 : i32
    %c0_i32_1 = arith.constant 0 : i32
    %c0_i32_2 = arith.constant 0 : i32
    return %c0_i32, %c0_i32_0, %c0_i32_1 : i32, i32, i32
  }
  func.func @transform_6(%arg0: i32) -> (i32, i32) {
    %c0_i32 = arith.constant 0 : i32
    %c0_i32_0 = arith.constant 0 : i32
    %c0_i32_1 = arith.constant 0 : i32
    return %c0_i32, %c0_i32_0 : i32, i32
  }
  func.func @transform_7(%arg0: i32) -> (i32, i32) {
    %c0_i32 = arith.constant 0 : i32
    %c0_i32_0 = arith.constant 0 : i32
    %c0_i32_1 = arith.constant 0 : i32
    return %c0_i32, %c0_i32_0 : i32, i32
  }
  func.func @transform_8(%arg0: i32) -> (i32, i32) {
    %c0_i32 = arith.constant 0 : i32
    %c0_i32_0 = arith.constant 0 : i32
    %c0_i32_1 = arith.constant 0 : i32
    return %c0_i32, %c0_i32_0 : i32, i32
  }
  func.func @transform_9(%arg0: i32) -> (i32, i32) {
    %c0_i32 = arith.constant 0 : i32
    %c0_i32_0 = arith.constant 0 : i32
    %c0_i32_1 = arith.constant 0 : i32
    return %c0_i32, %c0_i32_0 : i32, i32
  }
  func.func @transform_10(%arg0: i32) -> (i32, i32) {
    %c0_i32 = arith.constant 0 : i32
    %c0_i32_0 = arith.constant 0 : i32
    %c0_i32_1 = arith.constant 0 : i32
    return %c0_i32, %c0_i32_0 : i32, i32
  }
  func.func @transform_11(%arg0: i32) -> (i32, i32, i32) {
    %c0_i32 = arith.constant 0 : i32
    %c0_i32_0 = arith.constant 0 : i32
    %c0_i32_1 = arith.constant 0 : i32
    return %arg0, %c0_i32, %c0_i32_0 : i32, i32, i32
  }
}

</mosaic_0001>

<bundles_post_ra>
// kernel: net_forward.1
= control target key start
LH: loop header
LB: loop body
LE: loop exit
PB: predicated region body
PF: predicated region fallthrough
CT: control target
= control target key end

     0   :  { %16 = vsyncpa [#allocation3], 0  ;;  %s3497_s0 = inlined_call_operand.vmem [shape: f32[2,20,20], index: 0, kind: input, shape index: {}]   ;;  %s3498_s1 = inlined_call_operand.vmem [shape: bf16[5,20,128], index: 1, kind: input, shape index: {}]   ;;  %s3499_s2 = inlined_call_operand.vmem [shape: f32[1,128], index: 2, kind: input, shape index: {}]   ;;  %s3500_s3 = inlined_call_operand.vmem [shape: bf16[5,127,128], index: 3, kind: input, shape index: {}]   ;;  %s3501_s4 = inlined_call_operand.vmem [shape: f32[1,128], index: 4, kind: input, shape index: {}]   ;;  %s3502_s5 = inlined_call_operand.vmem [shape: bf16[2,127,384], index: 5, kind: input, shape index: {}]   ;;  %s3503_s6 = inlined_call_operand.vmem [shape: f32[1,384], index: 6, kind: input, shape index: {}]   ;;  %s3504_s7 = inlined_call_operand.vmem [shape: bf16[384,128], index: 7, kind: input, shape index: {}]   ;;  %s3505_s8 = inlined_call_operand.vmem [shape: f32[1,128], index: 8, kind: input, shape index: {}]   ;;  %s3506_s9 = inlined_call_operand.vmem [shape: bf16[128,128], index: 9, kind: input, shape index: {}]   ;;  %s3507_s10 = inlined_call_operand.vmem [shape: f32[1,128], index: 10, kind: input, shape index: {}]   ;;  %s3508_s11 = inlined_call_operand.hbm [shape: f32[2,1,128], index: 11, kind: output, shape index: {}]  }
   0x1   :  { %18 = vsyncpa [#allocation3 + $0x1], 0  ;;  %s2814_s17 = smov 0   ;;  %s2816_s18 = smov 0  }
   0x2   :  { %s2818_s19 = smov 0   ;;  %s2820_s20 = smov 0  }
   0x3 LB: > { %3510 = sst [smem:[#allocation5_spill]] %s2746_s19  ;;  %s2835_s21 = sadd.s32 4294967295, %s2750_s20   ;;  %s2750_s20 = sphi %s2820_s20, %s3518_s20   ;;  %s2746_s19 = sphi %s2818_s19, %s3515_s19   ;;  %s2742_s18 = sphi %s2816_s18, %s3517_s18   ;;  %s2738_s17 = sphi %s2814_s17, %s3516_s17  }
   0x4   : > { %s1883_s22 = sadd.s32 4294967294, %s2750_s20   ;;  %s2839_s23 = sadd.s32 1, %s2750_s20  }
   0x5   : > { %s267_s24 = sadd.s32 1, %s2746_s19  ;;  %s264_s25 = ssub.s32 %s2750_s20, %s2839_s23 }
   0x6   : > { %p277_p0 = scmp.ne.s32.totalorder %s2746_s19, %s2742_s18  ;;  %p265_p1 = scmp.eq.s32.totalorder %s264_s25, 0 }
   0x7   : > { %p278_p2 = scmp.eq.s32.totalorder %s2835_s21, 1  ;;  %p283_p3 = scmp.ne.s32.totalorder %s2742_s18, %s2738_s17 }
   0x8   : > { %p284_p4 = scmp.eq.s32.totalorder %s1883_s22, 1  ;;  %p1886_p7 = scmp.ge.s32.totalorder %s2750_s20, 1 }
   0x9   : > { %s2850_s26 = scalar_select %p265_p1, %s2746_s19, %s267_s24  }
   0xa   : > { %p2852_p5 = por %p278_p2, %p277_p0  ;;  %p2856_p6 = por %p284_p4, %p283_p3 }
   0xb   : > { %3511 = sst [smem:[#allocation6_spill]] %s2850_s26  ;;  %p340_p8 = scmp.lt.s32.totalorder %s2750_s20, 3 }
   0xd   : > { %p341_p9 = pnand %p1886_p7, %p340_p8 }
   0xe   : > { %p379_p10 = scmp.lt.s32.totalorder (!%p341_p9), %s2835_s21, 1  ;;  %s2753_s13 = smov (!%p341_p9), 127  }
   0xf   : > { %344 = sbr.rel (%p341_p9) target bundleno = 1029 (0x405), region = 64  ;;  %s1824_s12 = scalar_lea.hbm (!%p341_p9), %s3508_s11, %s2835_s21 }
  0x14   : > { %v1903_v0 = vld [vmem:[%s3498_s1 + $0x20] sm:$0x3]  ;;  %v1890_v1 = vld [vmem:[%s3498_s1 + $0x14] sm:$0x3]  ;;  %v390_v4 = vld [vmem:[%s3498_s1 + $0x8] sm:$0x3] }
  0x15   : > { %v484_v2 = vunpack.c.l.b16 %v1903_v0  ;;  %v415_v3 = vunpack.c.l.b16 %v1890_v1  ;;  %v1911_v5 = vld [vmem:[%s3498_s1 + $0x2c] sm:$0x3]  ;;  %vm423_vm0 = vcmask 1041408   ;;  %v446_v6 = vunpack.c.l.b16 %v390_v4  ;;  %s380_s24 = scalar_select %p379_p10, %s2835_s21, 1  ;;  %v1919_v10 = vld [vmem:[%s3498_s1 + $0x38] sm:$0x3] }
  0x16   : > { %v529_v7 = vunpack.c.l.b16 %v1911_v5  ;;  %v568_v15 = vunpack.c.l.b16 %v1919_v10  ;;  %v2516_v17 = vld [vmem:[%s3498_s1 + $0x18] sm:$0xff]  ;;  %v2515_v19 = vld [vmem:[%s3498_s1 + $0xc] sm:$0xff]  ;;  %v2514_v20 = vld [vmem:[%s3498_s1] sm:$0xff]  ;;  %vm419_vm1 = vcmask 162816   ;;  %vm475_vm2 = vcmask 1046528  }
  0x17   : > { %v486_v8 = vpack.c.b16 %v484_v2, %v484_v2  ;;  %v417_v9 = vpack.c.b16 %v415_v3, %v415_v3  ;;  %v448_v11 = vpack.c.b16 %v446_v6, %v446_v6  ;;  %s2639_s30 = smul.u32 24, %s380_s24  ;;  %v2517_v21 = vld [vmem:[%s3498_s1 + $0x24] sm:$0xff]  ;;  %v2518_v35 = vld [vmem:[%s3498_s1 + $0x30] sm:$0xff]  ;;  %vm397_vm3 = vsmask.f32 7424  ;;  %v2534_v55 = vld [vmem:[%s3500_s3 + $0x78] sm:$0xff] }
  0x18   : > { %v531_v12 = vpack.c.b16 %v529_v7, %v529_v7  ;;  %v570_v22 = vpack.c.b16 %v568_v15, %v568_v15  ;;  %vm514_vm4 = vsmask.f32 6400  ;;  %vm559_vm5 = vcmask 1045504   ;;  %v2526_v56 = vld [vmem:[%s3500_s3 + $0x38] sm:$0xff]  ;;  %v2533_v63 = vld [vmem:[%s3500_s3 + $0x70] sm:$0xff]  ;;  %v2532_v6 = vld [vmem:[%s3500_s3 + $0x68] sm:$0xff] }
  0x19   : > { %v492_v13 = vsel %vm423_vm0, %v486_v8, 0  ;;  %v425_v14 = vsel %vm423_vm0, %v417_v9, 0  ;;  %v453_v16 = vsel %vm423_vm0, %v448_v11, 0  ;;  %s383_s24 = scalar_lea.vmem %s3497_s0, %s2639_s30  ;;  %vm710_vm6 = vcmask 1047552   ;;  %v2542_v57 = vld [vmem:[%s3500_s3 + $0xb8] sm:$0xff]  ;;  %v2525_v1 = vld [vmem:[%s3500_s3 + $0x30] sm:$0xff] }
  0x1a   : > { %500 = vmatpush.bf16.msra.mxu2 %v492_v13  ;;  %433 = vmatpush.bf16.msra.mxu0 %v425_v14  ;;  %v537_v18 = vsel %vm423_vm0, %v531_v12, 0  ;;  %v385_v23 = vld [vmem:[%s383_s24] sm:$0xff]  ;;  %v386_v24 = vld [vmem:[%s383_s24 + $0x8] sm:$0xff]  ;;  %v387_v25 = vld [vmem:[%s383_s24 + $0x10] sm:$0xf]  ;;  %v576_v28 = vsel %vm423_vm0, %v570_v22, 0 }
  0x1b   : > { %461 = vmatpush.bf16.msra.mxu1 %v453_v16  ;;  %545 = vmatpush.bf16.msra.mxu3 %v537_v18  ;;  %v391_v26 = vpack.c.bf16 %v386_v24, %v385_v23  ;;  %v396_v27 = vpack.c.bf16 %v387_v25, %v387_v25  ;;  %v2752_v51 = vmov 65535   ;;  %v2550_v59 = vld [vmem:[%s3500_s3 + $0xf8] sm:$0xff]  ;;  %v2541_v2 = vld [vmem:[%s3500_s3 + $0xb0] sm:$0xff]  ;;  %v2524_v8 = vld [vmem:[%s3500_s3 + $0x28] sm:$0xff]  ;;  %vm706_vm7 = vcmask 1039360   ;;  %s1828_s24 = sshll.u32 %s1824_s12, 4  ;;  %s1829_s24 = int_to_ptr.hbm [resolvable:$true] %s1828_s24 }
  0x1c   : > { %v711_v52 = vsel %vm475_vm2, 4294967295, %v2752_v51  ;;  %v2549_v3 = vld [vmem:[%s3500_s3 + $0xf0] sm:$0xff]  ;;  %v2540_v9 = vld [vmem:[%s3500_s3 + $0xa8] sm:$0xff]  ;;  %v2531_v12 = vld [vmem:[%s3500_s3 + $0x60] sm:$0xff]  ;;  %s2702_s29 = sshra.s32 %s1829_s24, 4  ;;  %s2708_s30 = scalar_lea.hbm %s3508_s11, 2  ;;  %s2703_s29 = int_to_ptr.hbm [resolvable:$true] %s2702_s29 }
  0x1d   : > { %v476_v29 = vrot.slane %v391_v26, 1  ;;  %v477_v30 = vrot.slane %v396_v27, 1  ;;  %v399_v31 = vshrl.u32 %v391_v26, 16  ;;  %v401_v32 = vshll.u32 %v391_v26, 16  ;;  %v2548_v10 = vld [vmem:[%s3500_s3 + $0xe8] sm:$0xff]  ;;  %v2523_v14 = vld [vmem:[%s3500_s3 + $0x20] sm:$0xff]  ;;  %p2709_p0 = scmp.lt.s32.totalorder %s2703_s29, %s3508_s11 }
  0x1e   : > { %501 = vmatpush.bf16.msra.mxu2 %v2516_v17  ;;  %434 = vmatpush.bf16.msra.mxu0 %v2515_v19  ;;  %v406_v33 = vshll.u32 %v396_v27, 16  ;;  %v518_v34 = vshrl.u32 %v396_v27, 16  ;;  %v560_v48 = vrot.slane %v391_v26, 2  ;;  %v561_v49 = vrot.slane %v396_v27, 2  ;;  %v2539_v15 = vld [vmem:[%s3500_s3 + $0xa0] sm:$0xff]  ;;  %v2522_v22 = vld [vmem:[%s3500_s3 + $0x18] sm:$0xff] }
  0x1f   : > { %462 = vmatpush.bf16.msra.mxu1 %v2514_v20  ;;  %546 = vmatpush.bf16.msra.mxu3 %v2517_v21  ;;  %v478_v36 = vsel %vm475_vm2, %v476_v29, %v477_v30  ;;  %v403_v37 = vrot.slane %v401_v32, 1  ;;  %v515_v38 = vrot.slane %v399_v31, 1  ;;  %v516_v39 = vrot.slane %v401_v32, 2  ;;  %v2547_v16 = vld [vmem:[%s3500_s3 + $0xe0] sm:$0xff]  ;;  %v2530_v20 = vld [vmem:[%s3500_s3 + $0x58] sm:$0xff]  ;;  %v2529_v30 = vld [vmem:[%s3500_s3 + $0x50] sm:$0xff] }
  0x20   : > { %v408_v40 = vrot.slane %v406_v33, 1  ;;  %v520_v41 = vrot.slane %v518_v34, 1  ;;  %v521_v42 = vrot.slane %v406_v33, 2  ;;  %v562_v50 = vsel %vm559_vm5, %v560_v48, %v561_v49  ;;  %v2538_v23 = vld [vmem:[%s3500_s3 + $0x98] sm:$0xff]  ;;  %v2686_v29 = vld [vmem:[%s3499_s2] ss:$0 sm:$0xff] }
  0x21   : > { %1908 = vmatmul.msk.bf16.vlgmr.msra.gmra.mxu2 %vm419_vm1, %v478_v36  ;;  %v404_v43 = vor.u32 %v403_v37, %v399_v31  ;;  %v517_v44 = vor.u32 %v516_v39, %v515_v38  ;;  %v2909_v53 = vsel %vm710_vm6, %v711_v52, 0  ;;  %v2546_v25 = vld [vmem:[%s3500_s3 + $0xd8] sm:$0xff]  ;;  %v2536_v48 = vld [vmem:[%s3500_s3 + $0x88] sm:$0xff]  ;;  %v2519_v51 = vld [vmem:[%s3500_s3] sm:$0xff]  ;;  %s2704_s19 = scalar_lea.hbm %s2703_s29, 1 }
  0x22   : > { %584 = vmatpush.bf16.msrb.mxu0 %v576_v28  ;;  %1900 = vmatmul.msk.bf16.vlgmr.msra.gmra.mxu1 %vm419_vm1, %v391_v26  ;;  %v522_v45 = vor.u32 %v521_v42, %v520_v41  ;;  %v714_v58 = vand.u32 %v2534_v55, %v2909_v53  ;;  %v780_v61 = vand.u32 %v2526_v56, %v2909_v53  ;;  %v2558_v36 = vld [vmem:[%s3500_s3 + $0x138] sm:$0xff]  ;;  %v2544_v49 = vld [vmem:[%s3500_s3 + $0xc8] sm:$0xff]  ;;  %v2535_v52 = vld [vmem:[%s3500_s3 + $0x80] sm:$0xff]  ;;  %p2705_p11 = scmp.ne.s32.totalorder %s2703_s29, %s2704_s19  ;;  %p2710_p1 = scmp.lt.s32.totalorder %s2708_s30, %s2704_s19 }
  0x23   : > { %v409_v46 = vsel %vm397_vm3, %v404_v43, %v408_v40  ;;  %v864_v62 = vand.u32 %v2542_v57, %v2909_v53  ;;  %v949_v0 = vand.u32 %v2550_v59, %v2909_v53  ;;  %v2527_v40 = vld [vmem:[%s3500_s3 + $0x40] sm:$0xff]  ;;  %v1034_v41 = vand.u32 %v2558_v36, %v2909_v53  ;;  %v2521_v43 = vld [vmem:[%s3500_s3 + $0x10] sm:$0xff]  ;;  %v2554_v56 = vld [vmem:[%s3500_s3 + $0x118] sm:$0xff] }
  0x24   : > { %1895 = vmatmul.msk.bf16.vlgmr.msra.gmra.mxu0 %vm419_vm1, %v409_v46  ;;  %v523_v47 = vsel %vm514_vm4, %v517_v44, %v522_v45  ;;  %716 = vmatpush.bf16.msrb.mxu1 %v714_v58  ;;  %v2537_v44 = vld [vmem:[%s3500_s3 + $0x90] sm:$0xff]  ;;  %v2555_v55 = vld [vmem:[%s3500_s3 + $0x120] sm:$0xff]  ;;  %v2552_v58 = vld [vmem:[%s3500_s3 + $0x108] sm:$0xff]  ;;  %p2706_p12 = pnand %p2705_p11, %p2852_p5  ;;  %p2711_p2 = por %p2710_p1, %p2709_p0 }
  0x25   : > { %1916 = vmatmul.msk.bf16.vlgmr.msra.gmra.mxu3 %vm419_vm1, %v523_v47  ;;  %782 = vmatpush.bf16.msrb.mxu2 %v780_v61  ;;  %v2545_v45 = vld [vmem:[%s3500_s3 + $0xd0] sm:$0xff]  ;;  %v2520_v47 = vld [vmem:[%s3500_s3 + $0x8] sm:$0xff]  ;;  %v2551_v59 = vld [vmem:[%s3500_s3 + $0x100] sm:$0xff] }
  0x26   : > { %585 = vmatpush.bf16.msrb.mxu0 %v2518_v35  ;;  %866 = vmatpush.bf16.msrb.mxu3 %v864_v62  ;;  %v2528_v35 = vld [vmem:[%s3500_s3 + $0x48] sm:$0xff]  ;;  %v2557_v46 = vld [vmem:[%s3500_s3 + $0x130] sm:$0xff]  ;;  %p2707_p13 = pneg %p2706_p12 }
  0x27   : > { %v2553_v57 = vld [vmem:[%s3500_s3 + $0x110] sm:$0xff] }
  0x28   : > { %717 = vmatpush.bf16.msrb.mxu1 %v2533_v63  ;;  %p2712_p3 = pnand %p2711_p2, %p2707_p13 }
  0x29   : > { %783 = vmatpush.bf16.msrb.mxu2 %v2525_v1 }
  0x2a   : > { %951 = vmatpush.bf16.msra.mxu0 %v949_v0  ;;  %867 = vmatpush.bf16.msrb.mxu3 %v2541_v2 }
  0x2c   : > { %718 = vmatpush.bf16.msrb.mxu1 %v2532_v6 }
  0x2d   : > { %784 = vmatpush.bf16.msrb.mxu2 %v2524_v8 }
  0x2e   : > { %952 = vmatpush.bf16.msra.mxu0 %v2549_v3  ;;  %868 = vmatpush.bf16.msrb.mxu3 %v2540_v9 }
  0x30   : > { %719 = vmatpush.bf16.msrb.mxu1 %v2531_v12  ;;  %v2272_v12 = vld [vmem:[%s3502_s5 + $0x168] sm:$0xf] }
  0x31   : > { %785 = vmatpush.bf16.msrb.mxu2 %v2523_v14  ;;  %v2604_v14 = vld [vmem:[%s3502_s5 + $0x16c] sm:$0xf] }
  0x32   : > { %953 = vmatpush.bf16.msra.mxu0 %v2548_v10  ;;  %869 = vmatpush.bf16.msrb.mxu3 %v2539_v15 }
  0x34   : > { %1924 = vmatmul.msk.bf16.vlgmr.msrb.gmra.mxu0 %vm419_vm1, %v562_v50  ;;  %720 = vmatpush.bf16.msrb.mxu1 %v2530_v20  ;;  %v2556_v50 = vld [vmem:[%s3500_s3 + $0x128] sm:$0xff] }
  0x35   : > { %786 = vmatpush.bf16.msrb.mxu2 %v2522_v22  ;;  %v2262_v22 = vld [vmem:[%s3502_s5 + $0x15c] sm:$0xf0] }
  0x36   : > { %954 = vmatpush.bf16.msra.mxu0 %v2547_v16  ;;  %870 = vmatpush.bf16.msrb.mxu3 %v2538_v23  ;;  %v2274_v16 = vld [vmem:[%s3502_s5 + $0x174] sm:$0xf0] }
  0x38   : > { %721 = vmatpush.bf16.msrb.mxu1 %v2529_v30 }
  0x39   : > { %787 = vmatpush.bf16.msrb.mxu2 %v2521_v43  ;;  %v2236_v43 = vld [vmem:[%s3502_s5 + $0x120] sm:$0xf] }
  0x3a   : > { %955 = vmatpush.bf16.msra.mxu0 %v2546_v25  ;;  %871 = vmatpush.bf16.msrb.mxu3 %v2537_v44  ;;  %v2581_v25 = vld [vmem:[%s3502_s5 + $0xb0] sm:$0xf0] }
  0x3c   : > { %722 = vmatpush.bf16.msrb.mxu1 %v2528_v35  ;;  %v2250_v35 = vld [vmem:[%s3502_s5 + $0x144] sm:$0xf0] }
  0x3d   : > { %788 = vmatpush.bf16.msrb.mxu2 %v2520_v47 }
  0x3e   : > { %956 = vmatpush.bf16.msra.mxu0 %v2545_v45  ;;  %872 = vmatpush.bf16.msrb.mxu3 %v2536_v48  ;;  %v2596_v48 = vld [vmem:[%s3502_s5 + $0x128] sm:$0xf0] }
  0x40   : > { %723 = vmatpush.bf16.msrb.mxu1 %v2527_v40  ;;  %v2268_v40 = vld [vmem:[%s3502_s5 + $0x158] sm:$0xf] }
  0x41   : > { %789 = vmatpush.bf16.msrb.mxu2 %v2519_v51  ;;  %v2595_v51 = vld [vmem:[%s3502_s5 + $0x124] sm:$0xf] }
  0x42   : > { %957 = vmatpush.bf16.msra.mxu0 %v2544_v49  ;;  %873 = vmatpush.bf16.msrb.mxu3 %v2535_v52  ;;  %v2347_v49 = vld [vmem:[%s3502_s5 + $0x78] sm:$0xf]  ;;  %v2238_v52 = vld [vmem:[%s3502_s5 + $0x12c] sm:$0xf0] }
  0x44   : > { %1036 = vmatpush.bf16.msra.mxu1 %v1034_v41 }
  0x48   : > { %1037 = vmatpush.bf16.msra.mxu1 %v2557_v46  ;;  %v2603_v46 = vld [vmem:[%s3502_s5 + $0x160] sm:$0xf0] }
  0x4c   : > { %1038 = vmatpush.bf16.msra.mxu1 %v2556_v50  ;;  %v2575_v50 = vld [vmem:[%s3502_s5 + $0x80] sm:$0xf0] }
  0x50   : > { %1039 = vmatpush.bf16.msra.mxu1 %v2555_v55 }
  0x54   : > { %1040 = vmatpush.bf16.msra.mxu1 %v2554_v56  ;;  %v2256_v56 = vld [vmem:[%s3502_s5 + $0x140] sm:$0xf] }
  0x58   : > { %1041 = vmatpush.bf16.msra.mxu1 %v2553_v57  ;;  %v2600_v57 = vld [vmem:[%s3502_s5 + $0x148] sm:$0xf0] }
  0x5c   : > { %1042 = vmatpush.bf16.msra.mxu1 %v2552_v58  ;;  %v2237_v58 = vor.u32 %v2596_v48, %v2236_v43  ;;  %v2591_v43 = vld [vmem:[%s3502_s5 + $0x100] sm:$0xf0]  ;;  %v2188_v48 = vld [vmem:[%s3502_s5 + $0xc0] sm:$0xf] }
  0x60   : > { %1043 = vmatpush.bf16.msra.mxu1 %v2551_v59  ;;  %v2224_v59 = vld [vmem:[%s3502_s5 + $0x108] sm:$0xf] }
  0x9f   : > { %v464_v60 = vpop.f32.mrf.mxu1 }
  0xa1   : > { %v436_v54 = vpop.f32.mrf.mxu0 }
  0xa2   : > { %v465_v11 = vadd.f32 %v464_v60, %v436_v54  ;;  %v2543_v54 = vld [vmem:[%s3500_s3 + $0xc0] sm:$0xff] }
  0xa3   : > { %958 = vmatpush.bf16.msra.mxu0 %v2543_v54  ;;  %v2269_v54 = vor.u32 %v2603_v46, %v2268_v40 }
  0xa4   : > { %v503_v4 = vpop.f32.mrf.mxu2 }
  0xa5   : > { %v508_v18 = vadd.f32 %v503_v4, %v465_v11 }
  0xa7   : > { %v466_v13 = vpop.f32.mrf.mxu1 }
  0xa8   : > { %v548_v7 = vpop.f32.mrf.mxu3 }
  0xa9   : > { %v438_v5 = vpop.f32.mrf.mxu0  ;;  %v553_v24 = vadd.f32 %v548_v7, %v508_v18  ;;  %v2260_v18 = vld [vmem:[%s3502_s5 + $0x150] sm:$0xf] }
  0xaa   : > { %v467_v19 = vadd.f32 %v466_v13, %v438_v5  ;;  %v2605_v13 = vld [vmem:[%s3502_s5 + $0x170] sm:$0xf0] }
  0xab   : > { %v2273_v15 = vor.u32 %v2605_v13, %v2272_v12 }
  0xac   : > { %v505_v21 = vpop.f32.mrf.mxu2 }
  0xad   : > { %v509_v27 = vadd.f32 %v505_v21, %v467_v19  ;;  %v2602_v19 = vld [vmem:[%s3502_s5 + $0x158] sm:$0xf0]  ;;  %v1262_v20 = vand.u32 %v2273_v15, %v2909_v53  ;;  %v2601_v21 = vld [vmem:[%s3502_s5 + $0x154] sm:$0xf]  ;;  %v2323_v15 = vld [vmem:[%s3502_s5 + $0x48] sm:$0xf] }
  0xae   : > { %v2265_v30 = vor.u32 %v2601_v21, %v2262_v22  ;;  %v2232_v22 = vld [vmem:[%s3502_s5 + $0x110] sm:$0xf] }
  0xaf   : > { %1270 = vmatpush.bf16.msra.mxu2 %v1262_v20 }
  0xb0   : > { %v550_v26 = vpop.f32.mrf.mxu3 }
  0xb1   : > { %v587_v17 = vpop.f32.mrf.mxu0  ;;  %v554_v31 = vadd.f32 %v550_v26, %v509_v27  ;;  %v2261_v26 = vor.u32 %v2602_v19, %v2260_v18  ;;  %v2248_v27 = vld [vmem:[%s3502_s5 + $0x138] sm:$0xf]  ;;  %v2589_v18 = vld [vmem:[%s3502_s5 + $0xf4] sm:$0xf]  ;;  %v2214_v19 = vld [vmem:[%s3502_s5 + $0xfc] sm:$0xf0] }
  0xb2   : > { %v592_v28 = vadd.f32 %v587_v17, %v553_v24  ;;  %v2277_v17 = vor.u32 %v2604_v14, %v2274_v16  ;;  %v2371_v24 = vld [vmem:[%s3502_s5 + $0xa8] sm:$0xf]  ;;  %v2590_v14 = vld [vmem:[%s3502_s5 + $0xf8] sm:$0xf0]  ;;  %v2569_v16 = vld [vmem:[%s3502_s5 + $0x50] sm:$0xf0] }
  0xb3   : > { %1271 = vmatpush.bf16.msra.mxu2 %v2261_v26  ;;  %v2200_v26 = vld [vmem:[%s3502_s5 + $0xd8] sm:$0xf] }
  0xb4   : > { %v598_v33 = vadd.f32 %v2686_v29, %v592_v28  ;;  %v1265_v23 = vand.u32 %v2277_v17, %v2909_v53  ;;  %v2599_v28 = vld [vmem:[%s3502_s5 + $0x140] sm:$0xf0] }
  0xb6   : > { %v600_v38 = vmax.f32 %v598_v33, 0.0  ;;  %1283 = vmatpush.bf16.msra.mxu3 %v1265_v23  ;;  %v2359_v33 = vld [vmem:[%s3502_s5 + $0x90] sm:$0xf]  ;;  %v2594_v23 = vld [vmem:[%s3502_s5 + $0x118] sm:$0xf0] }
  0xb9   : > { %v589_v32 = vpop.f32.mrf.mxu0 }
  0xba   : > { %v593_v34 = vadd.f32 %v589_v32, %v554_v31  ;;  %v2280_v31 = vld [vmem:[%s3502_s5 + $0x170] sm:$0xf]  ;;  %v2606_v32 = vld [vmem:[%s3502_s5 + $0x178] sm:$0xf0]  ;;  %1284 = vmatpush.bf16.msra.mxu3 %v2265_v30 }
  0xbc   : > { %v599_v37 = vadd.f32 %v2686_v29, %v593_v34  ;;  %v2372_v29 = vor.u32 %v2581_v25, %v2371_v24  ;;  %v2598_v34 = vld [vmem:[%s3502_s5 + $0x13c] sm:$0xf]  ;;  %v2687_v24 = vld [vmem:[%s3501_s4] ss:$0 sm:$0xff] }
  0xbd   : > { %v2253_v47 = vor.u32 %v2598_v34, %v2250_v35  ;;  %v2566_v34 = vld [vmem:[%s3502_s5 + $0x38] sm:$0xf0] }
  0xbe   : > { %v601_v39 = vmax.f32 %v599_v37, 0.0  ;;  %v1438_v36 = vand.u32 %v2372_v29, %v2909_v53  ;;  %v2281_v37 = vor.u32 %v2606_v32, %v2280_v31  ;;  %v2324_v29 = vor.u32 %v2569_v16, %v2323_v15  ;;  %v2202_v32 = vld [vmem:[%s3502_s5 + $0xe4] sm:$0xf0]  ;;  %v2287_v16 = vld [vmem:[%s3502_s5] sm:$0xf] }
  0xbf   : > { %1285 = vmatpush.bf16.msra.mxu3 %v2253_v47  ;;  %v2217_v31 = vor.u32 %v2589_v18, %v2214_v19  ;;  %v2196_v19 = vld [vmem:[%s3502_s5 + $0xc8] sm:$0xf] }
  0xc0   : > { %v2681_v42 = vpack.i.bf16 %v601_v39, %v600_v38  ;;  %v1268_v44 = vand.u32 %v2281_v37, %v2909_v53  ;;  %v2580_v37 = vld [vmem:[%s3502_s5 + $0xac] sm:$0xf] }
  0xc2   : > { %2682 = vrot.lane.b32.xlu0 %v2681_v42, %s2753_s13  ;;  %v2249_v42 = vor.u32 %v2599_v28, %v2248_v27  ;;  %1296 = vmatpush.bf16.msrb.mxu0 %v1268_v44  ;;  %v2587_v27 = vld [vmem:[%s3502_s5 + $0xe0] sm:$0xf0]  ;;  %v2586_v28 = vld [vmem:[%s3502_s5 + $0xdc] sm:$0xf] }
  0xc3   : > { %v2205_v47 = vor.u32 %v2586_v28, %v2202_v32  ;;  %v2568_v28 = vld [vmem:[%s3502_s5 + $0x4c] sm:$0xf]  ;;  %v2570_v32 = vld [vmem:[%s3502_s5 + $0x58] sm:$0xf0] }
  0xc4   : > { %1272 = vmatpush.bf16.msra.mxu2 %v2249_v42  ;;  %v2582_v42 = vld [vmem:[%s3502_s5 + $0xb8] sm:$0xf0] }
  0xc6   : > { %1297 = vmatpush.bf16.msrb.mxu0 %v2269_v54  ;;  %v2190_v54 = vld [vmem:[%s3502_s5 + $0xcc] sm:$0xf0] }
  0xc8   : > { %1273 = vmatpush.bf16.msra.mxu2 %v2237_v58 }
 0x134   : > { %v2683_v60 = vpop.permute.xlu0 %2682 }
 0x135   : > { %v2685_v61 = vunpack.i.h.bf16 %v2683_v60  ;;  %v2684_v62 = vunpack.i.l.bf16 %v2683_v60  ;;  %v2348_v60 = vor.u32 %v2575_v50, %v2347_v49  ;;  %v2584_v49 = vld [vmem:[%s3502_s5 + $0xc8] sm:$0xf0] }
 0x136   : > { %v2189_v58 = vor.u32 %v2584_v49, %v2188_v48  ;;  %v2295_v48 = vld [vmem:[%s3502_s5 + $0x8] sm:$0xf]  ;;  %v2561_v49 = vld [vmem:[%s3502_s5 + $0x10] sm:$0xf0] }
 0x137   : > { %v611_v63 = vmax.f32 %v601_v39, %v2685_v61  ;;  %v610_v0 = vmax.f32 %v600_v38, %v2684_v62  ;;  %v2578_v38 = vld [vmem:[%s3502_s5 + $0x98] sm:$0xf0]  ;;  %v2241_v62 = vor.u32 %v2595_v51, %v2238_v52  ;;  %v2583_v52 = vld [vmem:[%s3502_s5 + $0xc4] sm:$0xf] }
 0x138   : > { %v2360_v45 = vor.u32 %v2578_v38, %v2359_v33  ;;  %v2311_v33 = vld [vmem:[%s3502_s5 + $0x30] sm:$0xf]  ;;  %v2373_v38 = vld [vmem:[%s3502_s5 + $0xb4] sm:$0xf0] }
 0x139   : > { %v616_v1 = vrot.slane %v611_v63, 1  ;;  %v615_v2 = vrot.slane %v610_v0, 1  ;;  %1286 = vmatpush.bf16.msra.mxu3 %v2241_v62  ;;  %v2312_v46 = vor.u32 %v2566_v34, %v2311_v33  ;;  %v2376_v50 = vor.u32 %v2580_v37, %v2373_v38  ;;  %v2577_v62 = vld [vmem:[%s3502_s5 + $0x94] sm:$0xf]  ;;  %v2567_v37 = vld [vmem:[%s3502_s5 + $0x40] sm:$0xf0] }
 0x13a   : > { %v2565_v34 = vld [vmem:[%s3502_s5 + $0x34] sm:$0xf] }
 0x13b   : > { %v621_v3 = vmax.f32 %v611_v63, %v616_v1  ;;  %v617_v4 = vsel %vm475_vm2, %v615_v2, %v616_v1  ;;  %v2593_v63 = vld [vmem:[%s3502_s5 + $0x110] sm:$0xf0]  ;;  %v2572_v1 = vld [vmem:[%s3502_s5 + $0x68] sm:$0xf0] }
 0x13c   : > { %v620_v5 = vmax.f32 %v610_v0, %v617_v4  ;;  %v2335_v0 = vld [vmem:[%s3502_s5 + $0x60] sm:$0xf]  ;;  %v2226_v4 = vld [vmem:[%s3502_s5 + $0x114] sm:$0xf0] }
 0x13d   : > { %v982_v11 = vpack.c.bf16 %v621_v3, %v621_v3  ;;  %v2336_v12 = vor.u32 %v2572_v1, %v2335_v0  ;;  %v2367_v1 = vld [vmem:[%s3502_s5 + $0x98] sm:$0xf] }
 0x13e   : > { %v656_v6 = vpack.c.bf16 %v621_v3, %v620_v5  ;;  %v638_v7 = vpack.c.bf16 %v620_v5, %v620_v5  ;;  %v2592_v3 = vld [vmem:[%s3502_s5 + $0x10c] sm:$0xf]  ;;  %v2257_v5 = vor.u32 %v2600_v57, %v2256_v56 }
 0x13f   : > { %v2229_v13 = vor.u32 %v2592_v3, %v2226_v4  ;;  %v2299_v4 = vld [vmem:[%s3502_s5 + $0x18] sm:$0xf] }
 0x140   : > { %2006 = vmatmul.msk.bf16.vlgmr.msrb.gmra.mxu2 %vm706_vm7, %v638_v7  ;;  %v658_v8 = vrot.slane %v656_v6, 1  ;;  %v812_v9 = vrot.slane %v656_v6, 2  ;;  %v897_v10 = vrot.slane %v656_v6, 3  ;;  %v2244_v7 = vld [vmem:[%s3502_s5 + $0x128] sm:$0xf]  ;;  %1298 = vmatpush.bf16.msrb.mxu0 %v2257_v5 }
 0x141   : > { %1287 = vmatpush.bf16.msra.mxu3 %v2229_v13  ;;  %v2563_v5 = vld [vmem:[%s3502_s5 + $0x20] sm:$0xf0]  ;;  %v2576_v13 = vld [vmem:[%s3502_s5 + $0x88] sm:$0xf0] }
 0x142   : > { %1973 = vmatmul.msk.bf16.vlgmr.msrb.gmra.mxu1 %vm706_vm7, %v658_v8  ;;  %2055 = vmatmul.msk.bf16.vlgmr.msrb.gmra.mxu3 %vm706_vm7, %v812_v9  ;;  %v2597_v8 = vld [vmem:[%s3502_s5 + $0x130] sm:$0xf0] }
 0x143   : > { %2104 = vmatmul.msk.bf16.vlgmr.msra.gmra.mxu0 %vm706_vm7, %v897_v10  ;;  %1446 = vmatpush.bf16.msrb.mxu1 %v1438_v36  ;;  %v2225_v10 = vor.u32 %v2593_v63, %v2224_v59  ;;  %v2245_v20 = vor.u32 %v2597_v8, %v2244_v7  ;;  %v2233_v36 = vor.u32 %v2594_v23, %v2232_v22  ;;  %v2361_v63 = vld [vmem:[%s3502_s5 + $0x9c] sm:$0xf0]  ;;  %v2588_v8 = vld [vmem:[%s3502_s5 + $0xe8] sm:$0xf0]  ;;  %v2337_v23 = vld [vmem:[%s3502_s5 + $0x6c] sm:$0xf0] }
 0x144   : > { %v2193_v59 = vor.u32 %v2583_v52, %v2190_v54  ;;  %v2208_v7 = vld [vmem:[%s3502_s5 + $0xe0] sm:$0xf]  ;;  %v2296_v52 = vor.u32 %v2561_v49, %v2295_v48  ;;  %v2614_v54 = vld [vmem:[%s3504_s7 + $0x38] sm:$0xff]  ;;  %v2636_v48 = vld [vmem:[%s3506_s9 + $0x28] sm:$0xff] }
 0x145   : > { %1274 = vmatpush.bf16.msra.mxu2 %v2225_v10  ;;  %1299 = vmatpush.bf16.msrb.mxu0 %v2245_v20  ;;  %v2209_v10 = vor.u32 %v2588_v8, %v2208_v7  ;;  %v2585_v20 = vld [vmem:[%s3502_s5 + $0xd0] sm:$0xf0]  ;;  %v2607_v7 = vld [vmem:[%s3504_s7] sm:$0xff] }
 0x146   : > { %1288 = vmatpush.bf16.msra.mxu3 %v2217_v31  ;;  %v2197_v22 = vor.u32 %v2585_v20, %v2196_v19  ;;  %v2619_v8 = vld [vmem:[%s3504_s7 + $0x60] sm:$0xff]  ;;  %v2638_v19 = vld [vmem:[%s3506_s9 + $0x38] sm:$0xff] }
 0x147   : > { %1447 = vmatpush.bf16.msrb.mxu1 %v2360_v45  ;;  %v2201_v45 = vor.u32 %v2587_v27, %v2200_v26  ;;  %v2635_v49 = vld [vmem:[%s3506_s9 + $0x20] sm:$0xff] }
 0x149   : > { %1300 = vmatpush.bf16.msrb.mxu0 %v2233_v36  ;;  %v2319_v36 = vld [vmem:[%s3502_s5 + $0x38] sm:$0xf] }
 0x14a   : > { %1289 = vmatpush.bf16.msra.mxu3 %v2205_v47  ;;  %v2289_v47 = vld [vmem:[%s3502_s5 + $0xc] sm:$0xf0] }
 0x14b   : > { %1448 = vmatpush.bf16.msrb.mxu1 %v2348_v60  ;;  %v1441_v60 = vand.u32 %v2376_v50, %v2909_v53 }
 0x14e   : > { %1290 = vmatpush.bf16.msra.mxu3 %v2193_v59  ;;  %v2612_v59 = vld [vmem:[%s3504_s7 + $0x28] sm:$0xff] }
 0x14f   : > { %1449 = vmatpush.bf16.msrb.mxu1 %v2336_v12  ;;  %v2355_v12 = vld [vmem:[%s3502_s5 + $0x80] sm:$0xf] }
 0x150   : > { %v2356_v15 = vor.u32 %v2576_v13, %v2355_v12  ;;  %v2617_v12 = vld [vmem:[%s3504_s7 + $0x50] sm:$0xff] }
 0x151   : > { %v2625_v13 = vld [vmem:[%s3504_s7 + $0x90] sm:$0xff] }
 0x152   : > { %2153 = vmatmul.msk.bf16.vlgmr.msra.gmra.mxu1 %vm706_vm7, %v982_v11  ;;  %v2212_v11 = vld [vmem:[%s3502_s5 + $0xf0] sm:$0xf] }
 0x153   : > { %v2213_v25 = vor.u32 %v2590_v14, %v2212_v11  ;;  %1450 = vmatpush.bf16.msrb.mxu1 %v2324_v29  ;;  %v2349_v11 = vld [vmem:[%s3502_s5 + $0x84] sm:$0xf0]  ;;  %v2325_v29 = vld [vmem:[%s3502_s5 + $0x54] sm:$0xf0] }
 0x154   : > { %v2328_v31 = vor.u32 %v2568_v28, %v2325_v29 }
 0x155   : > { %1275 = vmatpush.bf16.msra.mxu2 %v2213_v25  ;;  %v2573_v25 = vld [vmem:[%s3502_s5 + $0x70] sm:$0xf0] }
 0x157   : > { %1451 = vmatpush.bf16.msrb.mxu1 %v2312_v46  ;;  %v2559_v46 = vld [vmem:[%s3502_s5 + $0x4] sm:$0xf] }
 0x158   : > { %v2292_v50 = vor.u32 %v2559_v46, %v2289_v47  ;;  %v2637_v47 = vld [vmem:[%s3506_s9 + $0x30] sm:$0xff] }
 0x159   : > { %1276 = vmatpush.bf16.msra.mxu2 %v2201_v45 }
 0x15d   : > { %1277 = vmatpush.bf16.msra.mxu2 %v2189_v58 }
 0x161   : > { %1459 = vmatpush.bf16.msrb.mxu2 %v1441_v60 }
 0x1bf   : > { %v725_v39 = vpop.f32.mrf.mxu1 }
 0x1c0   : > { %v3106_v41 = vpop.f32.mrf.mxu0 }
 0x1c3   : > { %v791_v55 = vpop.f32.mrf.mxu2 }
 0x1c4   : > { %v792_v2 = vadd.f32 %v791_v55, %v725_v39  ;;  %v2379_v39 = vld [vmem:[%s3502_s5 + $0xb0] sm:$0xf] }
 0x1c5   : > { %v875_v61 = vpop.f32.mrf.mxu3  ;;  %v2380_v55 = vor.u32 %v2582_v42, %v2379_v39  ;;  %v2320_v39 = vor.u32 %v2567_v37, %v2319_v36  ;;  %v2301_v42 = vld [vmem:[%s3502_s5 + $0x24] sm:$0xf0] }
 0x1c6   : > { %v879_v17 = vadd.f32 %v875_v61, %v792_v2  ;;  %v2579_v2 = vld [vmem:[%s3502_s5 + $0xa0] sm:$0xf0] }
 0x1c7   : > { %v727_v6 = vpop.f32.mrf.mxu1  ;;  %v1444_v61 = vand.u32 %v2380_v55, %v2909_v53  ;;  %v2364_v53 = vor.u32 %v2577_v62, %v2361_v63  ;;  %v2368_v3 = vor.u32 %v2579_v2, %v2367_v1  ;;  %v2613_v55 = vld [vmem:[%s3504_s7 + $0x30] sm:$0xff]  ;;  %v2611_v62 = vld [vmem:[%s3504_s7 + $0x20] sm:$0xff]  ;;  %v2630_v1 = vld [vmem:[%s3504_s7 + $0xb8] sm:$0xff] }
 0x1c8   : > { %v962_v9 = vpop.f32.mrf.mxu0  ;;  %v964_v35 = vadd.f32 %v3106_v41, %v879_v17  ;;  %v2220_v41 = vld [vmem:[%s3502_s5 + $0xf8] sm:$0xf]  ;;  %v2300_v6 = vor.u32 %v2563_v5, %v2299_v4  ;;  %v2560_v17 = vld [vmem:[%s3502_s5 + $0x8] sm:$0xf0]  ;;  %v2609_v2 = vld [vmem:[%s3504_s7 + $0x10] sm:$0xff] }
 0x1c9   : > { %v2221_v56 = vor.u32 %v2591_v43, %v2220_v41  ;;  %1472 = vmatpush.bf16.msrb.mxu3 %v1444_v61  ;;  %1460 = vmatpush.bf16.msrb.mxu2 %v2364_v53  ;;  %v2574_v9 = vld [vmem:[%s3502_s5 + $0x7c] sm:$0xf]  ;;  %v2288_v18 = vor.u32 %v2560_v17, %v2287_v16  ;;  %v2307_v41 = vld [vmem:[%s3502_s5 + $0x20] sm:$0xf]  ;;  %v2564_v43 = vld [vmem:[%s3502_s5 + $0x28] sm:$0xf0] }
 0x1ca   : > { %1452 = vmatpush.bf16.msrb.mxu1 %v2300_v6  ;;  %v2352_v14 = vor.u32 %v2574_v9, %v2349_v11  ;;  %v2308_v45 = vor.u32 %v2564_v43, %v2307_v41  ;;  %v2621_v53 = vld [vmem:[%s3504_s7 + $0x70] sm:$0xff]  ;;  %v2608_v4 = vld [vmem:[%s3504_s7 + $0x8] sm:$0xff]  ;;  %v2627_v9 = vld [vmem:[%s3504_s7 + $0xa0] sm:$0xff] }
 0x1cb   : > { %v793_v21 = vpop.f32.mrf.mxu2  ;;  %1301 = vmatpush.bf16.msrb.mxu0 %v2221_v56  ;;  %v2620_v5 = vld [vmem:[%s3504_s7 + $0x68] sm:$0xff]  ;;  %v2626_v11 = vld [vmem:[%s3504_s7 + $0x98] sm:$0xff]  ;;  %v2615_v16 = vld [vmem:[%s3504_s7 + $0x40] sm:$0xff] }
 0x1cc   : > { %v2571_v21 = vld [vmem:[%s3502_s5 + $0x64] sm:$0xf]  ;;  %v2628_v6 = vld [vmem:[%s3504_s7 + $0xa8] sm:$0xff] }
 0x1cd   : > { %v877_v30 = vpop.f32.mrf.mxu3  ;;  %1473 = vmatpush.bf16.msrb.mxu3 %v2368_v3  ;;  %1461 = vmatpush.bf16.msrb.mxu2 %v2352_v14  ;;  %v2340_v26 = vor.u32 %v2571_v21, %v2337_v23  ;;  %v2629_v3 = vld [vmem:[%s3504_s7 + $0xb0] sm:$0xff]  ;;  %v2616_v14 = vld [vmem:[%s3504_s7 + $0x48] sm:$0xff]  ;;  %v2623_v17 = vld [vmem:[%s3504_s7 + $0x80] sm:$0xff] }
 0x1ce   : > { %1453 = vmatpush.bf16.msrb.mxu1 %v2288_v18  ;;  %v2331_v30 = vld [vmem:[%s3502_s5 + $0x50] sm:$0xf]  ;;  %v1485_v21 = vld [vmem:[%s3503_s6] sm:$0x7] }
 0x1cf   : > { %v1045_v40 = vpop.f32.mrf.mxu1  ;;  %1302 = vmatpush.bf16.msrb.mxu0 %v2209_v10  ;;  %v2332_v33 = vor.u32 %v2570_v32, %v2331_v30  ;;  %v2618_v10 = vld [vmem:[%s3504_s7 + $0x58] sm:$0xff] }
 0x1d0   : > { %v1049_v44 = vadd.f32 %v1045_v40, %v964_v35  ;;  %v2313_v35 = vld [vmem:[%s3502_s5 + $0x3c] sm:$0xf0]  ;;  %v2562_v40 = vld [vmem:[%s3502_s5 + $0x1c] sm:$0xf] }
 0x1d1   : > { %1474 = vmatpush.bf16.msrb.mxu3 %v2356_v15  ;;  %1462 = vmatpush.bf16.msrb.mxu2 %v2340_v26  ;;  %v2316_v38 = vor.u32 %v2565_v34, %v2313_v35  ;;  %v2624_v15 = vld [vmem:[%s3504_s7 + $0x88] sm:$0xff]  ;;  %v1489_v34 = vperm.slane %v1485_v21, 2 }
 0x1d2   : > { %v3230_v51 = vadd.f32 %v2687_v24, %v1049_v44  ;;  %v2343_v24 = vld [vmem:[%s3502_s5 + $0x68] sm:$0xf]  ;;  %v2304_v44 = vor.u32 %v2562_v40, %v2301_v42 }
 0x1d3   : > { %v2344_v27 = vor.u32 %v2573_v25, %v2343_v24  ;;  %1303 = vmatpush.bf16.msrb.mxu0 %v2197_v22  ;;  %v1487_v22 = vperm.slane %v1485_v21, 0 }
 0x1d4   : > { %v1055_v57 = vmax.f32 %v3230_v51, 0.0  ;;  %v2610_v51 = vld [vmem:[%s3504_s7 + $0x18] sm:$0xff] }
 0x1d5   : > { %1475 = vmatpush.bf16.msrb.mxu3 %v2344_v27  ;;  %1463 = vmatpush.bf16.msrb.mxu2 %v2328_v31 }
 0x1d6   : > { %1057 = vrot.lane.b32.xlu0 %v1055_v57, %s2753_s13  ;;  %s377_s13 = sand.u32 1, %s2742_s18  }
 0x1d7   : > { %v1047_v0 = vpop.f32.mrf.mxu1  ;;  %1695 = vmatpush.bf16.msra.mxu0 %v2614_v54  ;;  %v2632_v54 = vld [vmem:[%s3506_s9 + $0x8] sm:$0xff]  ;;  %s378_s16 = scalar_lea.vmem [#allocation2], %s377_s13  ;;  %s1816_s25 = scalar_lea.sflag [#allocation3], %s377_s13 }
 0x1d8   : > { %s1826_s22 = sshll.u32 %s378_s16, 4  ;;  %s1827_s22 = int_to_ptr.vmem [resolvable:$true] %s1826_s22 }
 0x1d9   : > { %1476 = vmatpush.bf16.msrb.mxu3 %v2332_v33  ;;  %1464 = vmatpush.bf16.msrb.mxu2 %v2316_v38  ;;  %v1488_v33 = vperm.slane %v1485_v21, 1 }
 0x1db   : > { %1696 = vmatpush.bf16.msra.mxu0 %v2613_v55  ;;  %v2631_v55 = vld [vmem:[%s3506_s9] sm:$0xff] }
 0x1dd   : > { %1477 = vmatpush.bf16.msrb.mxu3 %v2320_v39  ;;  %1465 = vmatpush.bf16.msrb.mxu2 %v2304_v44 }
 0x1df   : > { %1697 = vmatpush.bf16.msra.mxu0 %v2612_v59  ;;  %v1550_v59 = vld [vmem:[%s3505_s8] sm:$0x1] }
 0x1e1   : > { %1478 = vmatpush.bf16.msrb.mxu3 %v2308_v45  ;;  %1466 = vmatpush.bf16.msrb.mxu2 %v2292_v50  ;;  %v2634_v50 = vld [vmem:[%s3506_s9 + $0x18] sm:$0xff] }
 0x1e3   : > { %1698 = vmatpush.bf16.msra.mxu0 %v2611_v62 }
 0x1e5   : > { %1479 = vmatpush.bf16.msrb.mxu3 %v2296_v52  ;;  %v2633_v52 = vld [vmem:[%s3506_s9 + $0x10] sm:$0xff] }
 0x1e7   : > { %1699 = vmatpush.bf16.msra.mxu0 %v2610_v51 }
 0x1eb   : > { %1700 = vmatpush.bf16.msra.mxu0 %v2609_v2 }
 0x1ef   : > { %1701 = vmatpush.bf16.msra.mxu0 %v2608_v4 }
 0x1f3   : > { %1702 = vmatpush.bf16.msra.mxu0 %v2607_v7 }
 0x248   : > { %v1058_v56 = vpop.permute.xlu0 %1057 }
 0x249   : > { %v1060_v58 = vmax.f32 %v1055_v57, %v1058_v56  ;;  %v2622_v57 = vld [vmem:[%s3504_s7 + $0x78] sm:$0xff] }
 0x24a   : > { %1708 = vmatpush.bf16.msra.mxu1 %v2622_v57 }
 0x24b   : > { %v1062_v60 = vrot.slane %v1060_v58, 2 }
 0x24d   : > { %v1064_v61 = vmax.f32 %v1060_v58, %v1062_v60 }
 0x24e   : > { %1709 = vmatpush.bf16.msra.mxu1 %v2621_v53  ;;  %v1752_v53 = vld [vmem:[%s3507_s10] sm:$0x1] }
 0x24f   : > { %v1097_v63 = vpack.c.bf16 %v1064_v61, %v1064_v61 }
 0x251   : > { %v1132_v0 = vrot.slane %v1097_v63, 2  ;;  %2381 = vmatmul.msk.bf16.vlgmr.msrb.gmra.mxu1 %vm706_vm7, %v1097_v63 }
 0x252   : > { %1710 = vmatpush.bf16.msra.mxu1 %v2620_v5 }
 0x253   : > { %2282 = vmatmul.msk.bf16.vlgmr.msra.gmra.mxu2 %vm706_vm7, %v1132_v0  ;;  %2283 = vmatmul.msk.bf16.vlgmr.msra.gmra.mxu3 %vm706_vm7, %v1132_v0 }
 0x254   : > { %2284 = vmatmul.msk.bf16.vlgmr.msrb.gmra.mxu0 %vm706_vm7, %v1132_v0  ;;  %1721 = vmatpush.bf16.msra.mxu2 %v2630_v1 }
 0x255   : > { %1801 = vmatpush.bf16.msra.mxu3 %v2638_v19 }
 0x256   : > { %1711 = vmatpush.bf16.msra.mxu1 %v2619_v8 }
 0x258   : > { %1722 = vmatpush.bf16.msra.mxu2 %v2629_v3 }
 0x259   : > { %1802 = vmatpush.bf16.msra.mxu3 %v2637_v47 }
 0x25a   : > { %1712 = vmatpush.bf16.msra.mxu1 %v2618_v10 }
 0x25c   : > { %1723 = vmatpush.bf16.msra.mxu2 %v2628_v6 }
 0x25d   : > { %1803 = vmatpush.bf16.msra.mxu3 %v2636_v48 }
 0x25e   : > { %1713 = vmatpush.bf16.msra.mxu1 %v2617_v12 }
 0x260   : > { %1724 = vmatpush.bf16.msra.mxu2 %v2627_v9 }
 0x261   : > { %1804 = vmatpush.bf16.msra.mxu3 %v2635_v49 }
 0x262   : > { %1714 = vmatpush.bf16.msra.mxu1 %v2616_v14 }
 0x263   : > { %2382 = vmatmul.msk.bf16.vlgmr.msrb.gmra.mxu2 %vm706_vm7, %v1097_v63  ;;  %2383 = vmatmul.msk.bf16.vlgmr.msrb.gmra.mxu3 %vm706_vm7, %v1097_v63 }
 0x264   : > { %1725 = vmatpush.bf16.msra.mxu2 %v2626_v11 }
 0x265   : > { %1805 = vmatpush.bf16.msra.mxu3 %v2634_v50 }
 0x266   : > { %1715 = vmatpush.bf16.msra.mxu1 %v2615_v16 }
 0x268   : > { %1726 = vmatpush.bf16.msra.mxu2 %v2625_v13 }
 0x269   : > { %1806 = vmatpush.bf16.msra.mxu3 %v2633_v52 }
 0x26c   : > { %1727 = vmatpush.bf16.msra.mxu2 %v2624_v15 }
 0x26d   : > { %1807 = vmatpush.bf16.msra.mxu3 %v2632_v54 }
 0x270   : > { %1728 = vmatpush.bf16.msra.mxu2 %v2623_v17 }
 0x271   : > { %1808 = vmatpush.bf16.msra.mxu3 %v2631_v55 }
 0x2ce   : > { %v1455_v18 = vpop.f32.mrf.mxu1 }
 0x2d1   : > { %v1305_v20 = vpop.f32.mrf.mxu0 }
 0x2d6   : > { %v1279_v23 = vpop.f32.mrf.mxu2  ;;  %v1292_v24 = vpop.f32.mrf.mxu3 }
 0x2d7   : > { %v1456_v25 = vadd.f32 %v1455_v18, %v1279_v23  ;;  %v1457_v26 = vpop.f32.mrf.mxu1 }
 0x2d9   : > { %v1493_v27 = vadd.f32 %v1487_v22, %v1456_v25  ;;  %v1307_v28 = vpop.f32.mrf.mxu0 }
 0x2db   : > { %v1496_v29 = vmax.f32 %v1493_v27, 0.0 }
 0x2dd   : > { %v1547_v30 = vpack.c.bf16 %v1496_v29, %v1496_v29 }
 0x2de   : > { %v1281_v31 = vpop.f32.mrf.mxu2  ;;  %v1294_v32 = vpop.f32.mrf.mxu3 }
 0x2df   : > { %1703 = vmatmul.bf16.vlgmr.msra.gmra.mxu0 %v1547_v30 }
 0x2e6   : > { %v1468_v35 = vpop.f32.mrf.mxu2  ;;  %v1481_v36 = vpop.f32.mrf.mxu3 }
 0x2e7   : > { %v1469_v37 = vadd.f32 %v1468_v35, %v1292_v24  ;;  %v1482_v38 = vadd.f32 %v1481_v36, %v1305_v20 }
 0x2e9   : > { %v1494_v39 = vadd.f32 %v1488_v33, %v1469_v37  ;;  %v1495_v40 = vadd.f32 %v1489_v34, %v1482_v38 }
 0x2eb   : > { %v1497_v42 = vmax.f32 %v1494_v39, 0.0  ;;  %v1498_v41 = vmax.f32 %v1495_v40, 0.0 }
 0x2ed   : > { %v1548_v43 = vpack.c.bf16 %v1497_v42, %v1497_v42  ;;  %v1549_v44 = vpack.c.bf16 %v1498_v41, %v1498_v41 }
 0x2ee   : > { %v1470_v45 = vpop.f32.mrf.mxu2  ;;  %v1483_v46 = vpop.f32.mrf.mxu3 }
 0x2ef   : > { %1716 = vmatmul.bf16.vlgmr.msra.gmra.mxu1 %v1548_v43  ;;  %1729 = vmatmul.bf16.vlgmr.msra.gmra.mxu2 %v1549_v44 }
 0x35c   : > { %v1704_v56 = vpop.f32.mrf.mxu0 }
 0x35d   : > { %v1705_v61 = vadd.f32 %v1704_v56, %v1550_v59 }
 0x364   : > { %v1706_v58 = vpop.f32.mrf.mxu0 }
 0x36c   : > { %v1717_v60 = vpop.f32.mrf.mxu1 }
 0x36d   : > { %v1718_v62 = vadd.f32 %v1717_v60, %v1705_v61 }
 0x372   : > { %v1730_v63 = vpop.f32.mrf.mxu2 }
 0x373   : > { %v1731_v0 = vadd.f32 %v1730_v63, %v1718_v62 }
 0x374   : > { %v1719_v51 = vpop.f32.mrf.mxu1 }
 0x375   : > { %v1734_v57 = vmax.f32 %v1731_v0, 0.0 }
 0x377   : > { %v1751_v1 = vpack.c.bf16 %v1734_v57, %v1734_v57 }
 0x379   : > { %1809 = vmatmul.bf16.vlgmr.msra.gmra.mxu3 %v1751_v1 }
 0x37a   : > { %v1732_v2 = vpop.f32.mrf.mxu2 }
 0x3fc   : > { %v1810_v3 = vpop.f32.mrf.mxu3 }
 0x3fd   : > { %v1811_v4 = vadd.f32 %v1810_v3, %v1752_v53 }
 0x3ff   : > { %1814 = vst [vmem:[%s378_s16] sm:$0x1] %v1811_v4 }
 0x400   : > { %2715 = shalt.err (!%p2712_p3)
}
 0x401   : > { %2640 = dma.vmem_to_hbm [thread:$0]  (%p2852_p5), %s1827_s22, 16, %s1829_s24, %s1816_s25  }
 0x404   : > { %v1812_v5 = vpop.f32.mrf.mxu3 }
 0x405 PF: > { %p2646_p4 = scmp.ge.s32.totalorder %s2750_s20, 2  ;;  %s1840_s13 = sand.u32 1, %s2738_s17  }
 0x406   : > { %s1841_s12 = scalar_lea.sflag [#allocation3], %s1840_s13 }
 0x407   : > { %p2643_p7 = pnand %p2646_p4, %p2856_p6 }
 0x409   : > { %p2644_p8 = pneg %p2643_p7 }
 0x40b   : > { %2733 = dma.done.wait (%p2644_p8), %s1841_s12, 16  }
 0x40c   : > { %2735 = vsyncadd (%p2644_p8), %s1841_s12, 4294967280  ;;  %s3514_s16 = sld [smem:[#allocation5_spill]]  ;;  %p21_p9 = scmp.ge.s32.totalorder %s2839_s23, 4  }
 0x40d   : > { %s3515_s19 = sld [smem:[#allocation6_spill]]  ;;  %s3516_s17 = smov %s2742_s18 }
 0x40e   : > { %s3518_s20 = smov %s2839_s23  ;;  %23 = sbr.rel (!%p21_p9) target bundleno = 3 (0x3), region = 108 }
 0x412   : > { %s3517_s18 = smov %s3514_s16 }
 0x413   :  { %1846 = vsyncpa [#allocation3], 1 }
 0x414   :  { %1848 = vsyncpa [#allocation3 + $0x1], 1 }

</bundles_post_ra>
